<compile_context>
chip_gen: v6e
topology: v6e:2x2x1
jax: 0.10.0
libtpu: 0.0.40
codegen_flags: <defaults>
</compile_context>

<pallas_src>
import jax
import jax.numpy as jnp
from jax.experimental import pallas as pl
from jax.experimental.pallas import tpu as pltpu


def _make_fold_kernel(ax, d, with_mask):
    """Kernel factory closing over static axial_dim / feature dim / mask flag."""

    def kernel(*refs):
        if with_mask:
            x_ref, m_ref, tri_ref, w_ref, b_ref, o_ref, carry_ref = refs
        else:
            x_ref, tri_ref, w_ref, b_ref, o_ref, carry_ref = refs

        # x_ref:     (1, chunk, ax*D)   all ax folded rows of this batch elem
        # m_ref:     (1, chunk, ax)     folded mask (only if with_mask)
        # tri_ref:   (chunk, chunk)     f32 lower-triangular (resident)
        # w_ref:     (D, D)             f32 Linear weight     (resident)
        # b_ref:     (1, D)             f32 Linear bias       (resident)
        # o_ref:     (1, chunk, ax*D)   output block
        # carry_ref: (1, ax*D)          f32 running prefix sum across chunks

        @pl.when(pl.program_id(1) == 0)
        def _init():
            carry_ref[...] = jnp.zeros_like(carry_ref)

        x = x_ref[0].astype(jnp.float32)               # (chunk, ax*D)
        cn = x.shape[0]

        if with_mask:
            m = m_ref[0].astype(jnp.float32)           # (chunk, ax)
            # mask each axial column group; slices are 128-lane aligned.
            xm = jnp.concatenate(
                [x[:, a * d:(a + 1) * d] * m[:, a:a + 1] for a in range(ax)],
                axis=1)                                # (chunk, ax*D)
        else:
            xm = x

        # Causal cumsum along the folded sequence: one lower-triangular matmul
        # covers all ax folded rows at once (lanes are independent), plus the
        # running carry from previous chunks.
        y = jnp.dot(tri_ref[...], xm, preferred_element_type=jnp.float32)
        y = y + carry_ref[...]                         # (chunk, ax*D) f32
        carry_ref[...] = y[cn - 1:cn, :]               # prefix sum at last row

        # Position-wise Linear(D, D), applied per axial column group.
        w = w_ref[...]
        bv = b_ref[...]
        out = jnp.concatenate(
            [jnp.dot(y[:, a * d:(a + 1) * d], w,
                     preferred_element_type=jnp.float32) + bv
             for a in range(ax)], axis=1)              # (chunk, ax*D)
        o_ref[0] = out.astype(o_ref.dtype)

    return kernel


def fold_axially(x, input_mask, w, bias, *, axial_dim, chunk=None):
    b, t, d = x.shape
    ax = axial_dim
    assert t % ax == 0, "sequence length must be divisible by axial_dim"
    assert d % 128 == 0, "feature dim must be a multiple of 128 (lane width)"
    n = t // ax

    if chunk is None:
        # cap the resident triangle / MXU tile; 256 targets v6e/v7x MXU,
        # pass chunk=128 explicitly on v5e.
        chunk = min(n, 256)
    assert n % chunk == 0, "folded length must be divisible by chunk"
    assert chunk % 8 == 0 or chunk == n, "chunk must be a multiple of 8"
    nc = n // chunk

    # --- fold: a FREE reshape (no transpose, no HBM copy).
    # xr[b, i, a*d + j] == x[b, i*ax + a, j], i.e. column group `a` of the
    # last axis is exactly the folded sequence for axial index a.
    xr = x.reshape(b, n, ax * d)

    # resident f32 operands: causal triangle built once, fn's Linear params.
    row = jax.lax.broadcasted_iota(jnp.int32, (chunk, chunk), 0)
    col = jax.lax.broadcasted_iota(jnp.int32, (chunk, chunk), 1)
    tri = (row >= col).astype(jnp.float32)
    w_f = w.astype(jnp.float32)
    bias2 = bias.reshape(1, d).astype(jnp.float32)

    with_mask = input_mask is not None
    operands = [xr]
    in_specs = [pl.BlockSpec((1, chunk, ax * d), lambda g, c: (g, c, 0))]
    if with_mask:
        # free reshape: mr[b, i, a] == input_mask[b, i*ax + a]
        mr = input_mask.astype(jnp.float32).reshape(b, n, ax)
        operands.append(mr)
        in_specs.append(pl.BlockSpec((1, chunk, ax), lambda g, c: (g, c, 0)))
    operands += [tri, w_f, bias2]
    in_specs += [
        pl.BlockSpec((chunk, chunk), lambda g, c: (0, 0)),   # tri  (resident)
        pl.BlockSpec((d, d), lambda g, c: (0, 0)),           # W    (resident)
        pl.BlockSpec((1, d), lambda g, c: (0, 0)),           # bias (resident)
    ]

    yr = pl.pallas_call(
        _make_fold_kernel(ax, d, with_mask),
        out_shape=jax.ShapeDtypeStruct((b, n, ax * d), x.dtype),
        grid_spec=pltpu.PrefetchScalarGridSpec(
            num_scalar_prefetch=0,
            grid=(b, nc),
            in_specs=in_specs,
            out_specs=pl.BlockSpec((1, chunk, ax * d), lambda g, c: (g, c, 0)),
            scratch_shapes=[pltpu.VMEM((1, ax * d), jnp.float32)],  # prefix carry
        ),
        compiler_params=pltpu.CompilerParams(
            dimension_semantics=("parallel", "arbitrary")),
    )(*operands)

    # --- unfold: also a free reshape.
    return yr.reshape(b, t, d)


def _reference(x, mask, w, bias, ax):
    """Pure-JAX replica of PyTorch FoldAxially.forward with the same fn."""
    b, t, d = x.shape
    n = t // ax
    xf = x.reshape(b, n, ax, d).transpose(0, 2, 1, 3).reshape(b * ax, n, d)
    if mask is not None:
        mf = mask.reshape(b, n, ax).transpose(0, 2, 1).reshape(b * ax, n)
        xf = xf * mf[..., None]
    y = jnp.cumsum(xf, axis=1)
    y = y @ w + bias
    return y.reshape(b, ax, n, d).transpose(0, 2, 1, 3).reshape(b, t, d)


if __name__ == "__main__":
    # folded view: (B, n, AX*D) = (2, 256, 512)
    B, T, D, AX = 2, 1024, 128, 4

    key = jax.random.PRNGKey(0)
    kx, kw, kb = jax.random.split(key, 3)

    x = jax.random.normal(kx, (B, T, D), dtype=jnp.float32)
    # deterministic parameters for fn (Linear(D, D))
    w = jax.random.normal(kw, (D, D), dtype=jnp.float32) / jnp.sqrt(D)
    bias = 0.02 * jax.random.normal(kb, (D,), dtype=jnp.float32)
    # nontrivial input_mask: last 5 tokens masked out
    input_mask = (jnp.arange(T) < T - 5).astype(jnp.float32)[None, :].repeat(B, axis=0)

    # chunk=128 exercises the cross-chunk carry (n=256 -> 2 chunks) and is a
    # full MXU tile on v5e; the default chunk=min(n,256) targets v6e/v7x.
    out = fold_axially(x, input_mask, w, bias, axial_dim=AX, chunk=128)
    out = jax.block_until_ready(out)
    ref = _reference(x, input_mask, w, bias, AX)
    assert out.shape == (B, T, D)
    rel = jnp.linalg.norm(out - ref) / jnp.linalg.norm(ref)
    assert rel < 2e-2, f"relative error too large: {rel}"

    # no-mask fast path (mask stream and multiply dropped entirely)
    out2 = jax.block_until_ready(fold_axially(x, None, w, bias, axial_dim=AX))
    ref2 = _reference(x, None, w, bias, AX)
    rel2 = jnp.linalg.norm(out2 - ref2) / jnp.linalg.norm(ref2)
    assert rel2 < 2e-2, f"relative error too large (no mask): {rel2}"

    print("KERNEL_OK")
</pallas_src>

<mosaic_0001>
module attributes {stable_mosaic.version = 11 : i64} {
  func.func @kernel(%arg0: i32, %arg1: i32, %arg2: memref<1x128x512xf32, #tpu.memory_space<vmem>>, %arg3: memref<1x128x4xf32, #tpu.memory_space<vmem>>, %arg4: memref<128x128xf32, #tpu.memory_space<vmem>>, %arg5: memref<128x128xf32, #tpu.memory_space<vmem>>, %arg6: memref<1x128xf32, #tpu.memory_space<vmem>>, %arg7: memref<1x128x512xf32, #tpu.memory_space<vmem>>, %arg8: memref<1x512xf32, #tpu.memory_space<vmem>>) attributes {dimension_semantics = [#tpu.dimension_semantics<parallel>, #tpu.dimension_semantics<arbitrary>], iteration_bounds = array<i64: 2, 2>, scalar_prefetch = 0 : i64, scratch_operands = 1 : i64, tpu.core_type = #tpu.core_type<tc>, window_params = [{transform_indices = @transform_0, window_bounds = array<i64: 1, 128, 512>}, {transform_indices = @transform_1, window_bounds = array<i64: 1, 128, 4>}, {pipeline_mode = #tpu.pipeline_mode<synchronous>, transform_indices = @transform_2, window_bounds = array<i64: 128, 128>}, {pipeline_mode = #tpu.pipeline_mode<synchronous>, transform_indices = @transform_3, window_bounds = array<i64: 128, 128>}, {pipeline_mode = #tpu.pipeline_mode<synchronous>, transform_indices = @transform_4, window_bounds = array<i64: 1, 128>}, {transform_indices = @transform_5, window_bounds = array<i64: 1, 128, 512>}]} {
    %c0_i32 = arith.constant 0 : i32
    %0 = arith.cmpi eq, %arg1, %c0_i32 : i32
    %1 = arith.extui %0 : i1 to i32
    %c0_i32_0 = arith.constant 0 : i32
    %2 = arith.cmpi ne, %1, %c0_i32_0 : i32
    scf.if %2 {
      %cst_23 = arith.constant 0.000000e+00 : f32
      %53 = vector.broadcast %cst_23 : f32 to vector<1x512xf32>
      %c0_24 = arith.constant 0 : index
      %c0_25 = arith.constant 0 : index
      %54 = vector.load %arg8[%c0_24, %c0_25] : memref<1x512xf32, #tpu.memory_space<vmem>>, vector<1x512xf32>
      tpu.vector_store %arg8[%c0_24, %c0_25], %53 {strides = array<i32>} : memref<1x512xf32, #tpu.memory_space<vmem>>, vector<1x512xf32>,
    } else {
    }
    %c0 = arith.constant 0 : index
    %c0_1 = arith.constant 0 : index
    %c0_2 = arith.constant 0 : index
    %3 = vector.load %arg2[%c0, %c0_1, %c0_2] : memref<1x128x512xf32, #tpu.memory_space<vmem>>, vector<1x128x512xf32>
    %4 = vector.shape_cast %3 : vector<1x128x512xf32> to vector<128x512xf32>
    %c0_3 = arith.constant 0 : index
    %c0_4 = arith.constant 0 : index
    %c0_5 = arith.constant 0 : index
    %5 = vector.load %arg3[%c0_3, %c0_4, %c0_5] : memref<1x128x4xf32, #tpu.memory_space<vmem>>, vector<1x128x4xf32>
    %6 = vector.shape_cast %5 : vector<1x128x4xf32> to vector<128x4xf32>
    %7 = vector.extract_strided_slice %4 {offsets = [0, 0], sizes = [128, 128], strides = [1, 1]} : vector<128x512xf32> to vector<128x128xf32>
    %8 = vector.extract_strided_slice %6 {offsets = [0, 0], sizes = [128, 1], strides = [1, 1]} : vector<128x4xf32> to vector<128x1xf32>
    %9 = vector.broadcast %8 : vector<128x1xf32> to vector<128x128xf32>
    %10 = arith.mulf %7, %9 : vector<128x128xf32>
    %11 = vector.extract_strided_slice %4 {offsets = [0, 128], sizes = [128, 128], strides = [1, 1]} : vector<128x512xf32> to vector<128x128xf32>
    %12 = vector.extract_strided_slice %6 {offsets = [0, 1], sizes = [128, 1], strides = [1, 1]} : vector<128x4xf32> to vector<128x1xf32>
    %13 = vector.broadcast %12 : vector<128x1xf32> to vector<128x128xf32>
    %14 = arith.mulf %11, %13 : vector<128x128xf32>
    %15 = vector.extract_strided_slice %4 {offsets = [0, 256], sizes = [128, 128], strides = [1, 1]} : vector<128x512xf32> to vector<128x128xf32>
    %16 = vector.extract_strided_slice %6 {offsets = [0, 2], sizes = [128, 1], strides = [1, 1]} : vector<128x4xf32> to vector<128x1xf32>
    %17 = vector.broadcast %16 : vector<128x1xf32> to vector<128x128xf32>
    %18 = arith.mulf %15, %17 : vector<128x128xf32>
    %19 = vector.extract_strided_slice %4 {offsets = [0, 384], sizes = [128, 128], strides = [1, 1]} : vector<128x512xf32> to vector<128x128xf32>
    %20 = vector.extract_strided_slice %6 {offsets = [0, 3], sizes = [128, 1], strides = [1, 1]} : vector<128x4xf32> to vector<128x1xf32>
    %21 = vector.broadcast %20 : vector<128x1xf32> to vector<128x128xf32>
    %22 = arith.mulf %19, %21 : vector<128x128xf32>
    %23 = tpu.concatenate %10, %14, %18, %22 in 1 : vector<128x128xf32>, vector<128x128xf32>, vector<128x128xf32>, vector<128x128xf32> -> vector<128x512xf32>
    %c0_6 = arith.constant 0 : index
    %c0_7 = arith.constant 0 : index
    %24 = vector.load %arg4[%c0_6, %c0_7] : memref<128x128xf32, #tpu.memory_space<vmem>>, vector<128x128xf32>
    %cst = arith.constant dense<0.000000e+00> : vector<128x512xf32>
    %25 = tpu.matmul %24, %23, %cst {dimension_numbers = #tpu.dot_dimension_numbers<[1], [0], [0], [1], [0, 0, 1, 1], [], []>} : vector<128x128xf32>, vector<128x512xf32>, vector<128x512xf32> -> vector<128x512xf32>
    %c0_8 = arith.constant 0 : index
    %c0_9 = arith.constant 0 : index
    %26 = vector.load %arg8[%c0_8, %c0_9] : memref<1x512xf32, #tpu.memory_space<vmem>>, vector<1x512xf32>
    %27 = vector.broadcast %26 : vector<1x512xf32> to vector<128x512xf32>
    %28 = arith.addf %25, %27 : vector<128x512xf32>
    %29 = vector.extract_strided_slice %28 {offsets = [127, 0], sizes = [1, 512], strides = [1, 1]} : vector<128x512xf32> to vector<1x512xf32>
    %c0_10 = arith.constant 0 : index
    %c0_11 = arith.constant 0 : index
    %30 = vector.load %arg8[%c0_10, %c0_11] : memref<1x512xf32, #tpu.memory_space<vmem>>, vector<1x512xf32>
    tpu.vector_store %arg8[%c0_10, %c0_11], %29 {strides = array<i32>} : memref<1x512xf32, #tpu.memory_space<vmem>>, vector<1x512xf32>,
    %c0_12 = arith.constant 0 : index
    %c0_13 = arith.constant 0 : index
    %31 = vector.load %arg5[%c0_12, %c0_13] : memref<128x128xf32, #tpu.memory_space<vmem>>, vector<128x128xf32>
    %c0_14 = arith.constant 0 : index
    %c0_15 = arith.constant 0 : index
    %32 = vector.load %arg6[%c0_14, %c0_15] : memref<1x128xf32, #tpu.memory_space<vmem>>, vector<1x128xf32>
    %33 = vector.extract_strided_slice %28 {offsets = [0, 0], sizes = [128, 128], strides = [1, 1]} : vector<128x512xf32> to vector<128x128xf32>
    %cst_16 = arith.constant dense<0.000000e+00> : vector<128x128xf32>
    %34 = tpu.matmul %33, %31, %cst_16 {dimension_numbers = #tpu.dot_dimension_numbers<[1], [0], [0], [1], [0, 0, 1, 1], [], []>} : vector<128x128xf32>, vector<128x128xf32>, vector<128x128xf32> -> vector<128x128xf32>
    %35 = vector.broadcast %32 : vector<1x128xf32> to vector<128x128xf32>
    %36 = arith.addf %34, %35 : vector<128x128xf32>
    %37 = vector.extract_strided_slice %28 {offsets = [0, 128], sizes = [128, 128], strides = [1, 1]} : vector<128x512xf32> to vector<128x128xf32>
    %cst_17 = arith.constant dense<0.000000e+00> : vector<128x128xf32>
    %38 = tpu.matmul %37, %31, %cst_17 {dimension_numbers = #tpu.dot_dimension_numbers<[1], [0], [0], [1], [0, 0, 1, 1], [], []>} : vector<128x128xf32>, vector<128x128xf32>, vector<128x128xf32> -> vector<128x128xf32>
    %39 = vector.broadcast %32 : vector<1x128xf32> to vector<128x128xf32>
    %40 = arith.addf %38, %39 : vector<128x128xf32>
    %41 = vector.extract_strided_slice %28 {offsets = [0, 256], sizes = [128, 128], strides = [1, 1]} : vector<128x512xf32> to vector<128x128xf32>
    %cst_18 = arith.constant dense<0.000000e+00> : vector<128x128xf32>
    %42 = tpu.matmul %41, %31, %cst_18 {dimension_numbers = #tpu.dot_dimension_numbers<[1], [0], [0], [1], [0, 0, 1, 1], [], []>} : vector<128x128xf32>, vector<128x128xf32>, vector<128x128xf32> -> vector<128x128xf32>
    %43 = vector.broadcast %32 : vector<1x128xf32> to vector<128x128xf32>
    %44 = arith.addf %42, %43 : vector<128x128xf32>
    %45 = vector.extract_strided_slice %28 {offsets = [0, 384], sizes = [128, 128], strides = [1, 1]} : vector<128x512xf32> to vector<128x128xf32>
    %cst_19 = arith.constant dense<0.000000e+00> : vector<128x128xf32>
    %46 = tpu.matmul %45, %31, %cst_19 {dimension_numbers = #tpu.dot_dimension_numbers<[1], [0], [0], [1], [0, 0, 1, 1], [], []>} : vector<128x128xf32>, vector<128x128xf32>, vector<128x128xf32> -> vector<128x128xf32>
    %47 = vector.broadcast %32 : vector<1x128xf32> to vector<128x128xf32>
    %48 = arith.addf %46, %47 : vector<128x128xf32>
    %49 = tpu.concatenate %36, %40, %44, %48 in 1 : vector<128x128xf32>, vector<128x128xf32>, vector<128x128xf32>, vector<128x128xf32> -> vector<128x512xf32>
    %c0_20 = arith.constant 0 : index
    %c0_21 = arith.constant 0 : index
    %c0_22 = arith.constant 0 : index
    %50 = vector.load %arg7[%c0_20, %c0_21, %c0_22] : memref<1x128x512xf32, #tpu.memory_space<vmem>>, vector<1x128x512xf32>
    %51 = vector.shape_cast %50 : vector<1x128x512xf32> to vector<128x512xf32>
    %52 = vector.shape_cast %49 : vector<128x512xf32> to vector<1x128x512xf32>
    tpu.vector_store %arg7[%c0_20, %c0_21, %c0_22], %52 {strides = array<i32>} : memref<1x128x512xf32, #tpu.memory_space<vmem>>, vector<1x128x512xf32>,
    return
  }
  func.func @transform_0(%arg0: i32, %arg1: i32) -> (i32, i32, i32) {
    %c0_i32 = arith.constant 0 : i32
    %c0_i32_0 = arith.constant 0 : i32
    return %arg0, %arg1, %c0_i32 : i32, i32, i32
  }
  func.func @transform_1(%arg0: i32, %arg1: i32) -> (i32, i32, i32) {
    %c0_i32 = arith.constant 0 : i32
    %c0_i32_0 = arith.constant 0 : i32
    return %arg0, %arg1, %c0_i32 : i32, i32, i32
  }
  func.func @transform_2(%arg0: i32, %arg1: i32) -> (i32, i32) {
    %c0_i32 = arith.constant 0 : i32
    %c0_i32_0 = arith.constant 0 : i32
    %c0_i32_1 = arith.constant 0 : i32
    return %c0_i32, %c0_i32_0 : i32, i32
  }
  func.func @transform_3(%arg0: i32, %arg1: i32) -> (i32, i32) {
    %c0_i32 = arith.constant 0 : i32
    %c0_i32_0 = arith.constant 0 : i32
    %c0_i32_1 = arith.constant 0 : i32
    return %c0_i32, %c0_i32_0 : i32, i32
  }
  func.func @transform_4(%arg0: i32, %arg1: i32) -> (i32, i32) {
    %c0_i32 = arith.constant 0 : i32
    %c0_i32_0 = arith.constant 0 : i32
    %c0_i32_1 = arith.constant 0 : i32
    return %c0_i32, %c0_i32_0 : i32, i32
  }
  func.func @transform_5(%arg0: i32, %arg1: i32) -> (i32, i32, i32) {
    %c0_i32 = arith.constant 0 : i32
    %c0_i32_0 = arith.constant 0 : i32
    return %arg0, %arg1, %c0_i32 : i32, i32, i32
  }
}

</mosaic_0001>

<bundles_post_ra>
// kernel: tpu_custom_call.1
= control target key start
LH: loop header
LB: loop body
LE: loop exit
PB: predicated region body
PF: predicated region fallthrough
CT: control target
= control target key end

     0   :  { %10 = vsyncpa [#allocation4], 0  ;;  %s3479_s0 = inlined_call_operand.hbm [shape: f32[2,256,512], index: 0, kind: input, shape index: {}]   ;;  %s3480_s1 = inlined_call_operand.vmem [shape: f32[2,256,4], index: 1, kind: input, shape index: {}]   ;;  %s3481_s2 = inlined_call_operand.vmem [shape: f32[128,128], index: 2, kind: input, shape index: {}]   ;;  %s3482_s3 = inlined_call_operand.vmem [shape: f32[128,128], index: 3, kind: input, shape index: {}]   ;;  %s3483_s4 = inlined_call_operand.vmem [shape: f32[1,128], index: 4, kind: input, shape index: {}]   ;;  %s3484_s5 = inlined_call_operand.hbm [shape: f32[2,256,512], index: 5, kind: output, shape index: {}]  }
   0x1   :  { %12 = vsyncpa [#allocation4 + $0x1], 0 }
   0x2   :  { %13 = vsyncpa [#allocation5], 0 }
   0x3   :  { %15 = vsyncpa [#allocation5 + $0x1], 0  ;;  %s2569_s18 = smov 0   ;;  %s2571_s19 = smov 0  }
   0x4   :  { %s2573_s20 = smov 0   ;;  %s2575_s21 = smov 0  }
   0x5   :  { %s2577_s22 = smov 0   ;;  %s2579_s23 = smov 0  }
   0x6   :  { %s2581_s24 = smov 0   ;;  %s2583_s25 = smov 0  }
   0x7 LB: > { %3489 = sst [smem:[#allocation9_spill]] %s2496_s18  ;;  %s1912_s26 = sadd.s32 4294967295, %s2524_s25   ;;  %s2524_s25 = sphi %s2583_s25, %s21_s25   ;;  %s2520_s24 = sphi %s2581_s24, %s3506_s24   ;;  %s2516_s23 = sphi %s2579_s23, %s3500_s23   ;;  %s2512_s22 = sphi %s2577_s22, %s3505_s22   ;;  %s2508_s21 = sphi %s2575_s21, %s3499_s21   ;;  %s2504_s20 = sphi %s2573_s20, %s3504_s20   ;;  %s2500_s19 = sphi %s2571_s19, %s3503_s19   ;;  %s2496_s18 = sphi %s2569_s18, %s3502_s18  }
   0x8   : > { %3490 = sst [smem:[#allocation10_spill]] %s2516_s23  ;;  %s1913_s27 = sadd.s32 4294967294, %s2524_s25  }
   0x9   : > { %s30_s28 = sadd.s32 1, %s2516_s23  ;;  %s33_s29 = sadd.s32 1, %s2520_s24 }
   0xa   : > { %p31_p0 = scmp.ge.s32.totalorder %s30_s28, 2  ;;  %s42_s30 = sadd.s32 1, %s2504_s20 }
   0xb   : > { %p49_p1 = scmp.ne.s32.totalorder %s2504_s20, %s2500_s19  ;;  %p50_p2 = scmp.eq.s32.totalorder %s2524_s25, 0 }
   0xc   : > { %s3508_s28 = smov (%p31_p0, %s30_s28), 0  ;;  %s3510_s29 = smov (!%p31_p0, %s33_s29), %s2520_s24 }
   0xd   : > { %3491 = sst [smem:[#allocation11_spill]] %s3508_s28  ;;  %s38_s6 = ssub.s32 %s2516_s23, %s3508_s28 }
   0xe   : > { %p2622_p3 = por %p50_p2, %p49_p1  ;;  %p35_p4 = scmp.ge.s32.totalorder %s3510_s29, 2 }
   0xf   : > { %p55_p5 = scmp.ne.s32.totalorder %s2500_s19, %s2496_s18  ;;  %p56_p6 = scmp.eq.s32.totalorder %s1912_s26, 0 }
  0x10   : > { %p172_p7 = scmp.eq.s32.totalorder %s1912_s26, 3  ;;  %s3512_s29 = smov (%p35_p4, %s3510_s29), 0 }
  0x11   : > { %3493 = sst [smem:[#allocation12_spill]] %s3512_s29  ;;  %p2630_p8 = por %p56_p6, %p55_p5 }
  0x12   : > { %p2634_p9 = por %p172_p7, %p49_p1  ;;  %s37_s10 = ssub.s32 %s2520_s24, %s3512_s29 }
  0x13   : > { %p178_p10 = scmp.eq.s32.totalorder %s1913_s27, 3  ;;  %s39_s11 = sor.u32 %s38_s6, %s37_s10 }
  0x14   : > { %p40_p11 = scmp.eq.s32.totalorder %s39_s11, 0  ;;  %p2302_p13 = scmp.lt.s32.totalorder %s2524_s25, 4 }
  0x15   : > { %p2640_p12 = por %p178_p10, %p55_p5  ;;  %s207_s13 = sand.u32 1, %s2504_s20  }
  0x16   : > { %s2647_s14 = scalar_select %p40_p11, %s2504_s20, %s42_s30  }
  0x17   : > { %s1916_s15 = sshll.u32 %s207_s13, 9  ;;  %s1936_s16 = sshll.u32 %s2516_s23, 6 }
  0x18   : > { %s1919_s17 = sshll.u32 %s2520_s24, 7  ;;  %s211_s26 = scalar_lea.vmem [#allocation3], %s1916_s15 }
  0x19   : > { %s221_s28 = sshll.u32 %s211_s26, 4  ;;  %s218_s18 = sadd.s32 %s1936_s16, %s1919_s17  ;;  %s222_s28 = int_to_ptr.vmem [resolvable:$true] %s221_s28 }
  0x1a   : > { %s1920_s29 = sshll.u32 %s218_s18, 7  ;;  %p2653_p0 = pnand %p2302_p13, %p2622_p3 }
  0x1b   : > { %s220_s11 = scalar_lea.hbm %s3479_s0, %s1920_s29  ;;  %s208_s30 = scalar_lea.sflag [#allocation4], %s207_s13 }
  0x1c   : > { %p2402_p1 = pneg %p2653_p0  ;;  %s2413_s23 = scalar_lea.vmem %s222_s28, 8192 }
  0x1d   : > { %p2414_p2 = scmp.ne.s32.totalorder %s222_s28, %s2413_s23  ;;  %s2526_s15 = smov [#allocation3]  }
  0x1e   : > { %s2418_s16 = sshll.u32 %s2526_s15, 4  ;;  %s2419_s16 = int_to_ptr.vmem [resolvable:$false] %s2418_s16 }
  0x1f   : > { %p2416_p4 = pnand %p2414_p2, %p2402_p1  ;;  %s2420_s18 = scalar_lea.vmem %s2419_s16, 16384 }
  0x20   : > { %p2421_p3 = scmp.lt.s32.totalorder %s222_s28, %s2419_s16  ;;  %p2422_p6 = scmp.lt.s32.totalorder %s2420_s18, %s2413_s23 }
  0x21   : > { %p2417_p5 = pneg %p2416_p4 }
  0x22   : > { %p2423_p7 = por %p2422_p6, %p2421_p3 }
  0x24   : > { %p2424_p10 = pnand %p2423_p7, %p2417_p5 }
  0x26   : > { %2427 = shalt.err (!%p2424_p10)
}
  0x27   : > { %s2527_s7 = smov 512   ;;  %s2528_s29 = smov 32  }
  0x28   : > { %2297 = dma.hbm_to_vmem [thread:$0]  (!%p2653_p0), %s220_s11, 8192, %s222_s28, %s208_s30, %s2527_s7, %s2527_s7, %s2528_s29  }
  0x29   : > { %p1921_p11 = scmp.ge.s32.totalorder %s2524_s25, 1  ;;  %p242_p13 = scmp.lt.s32.totalorder %s2524_s25, 5 }
  0x2b   : > { %p243_p1 = pnand %p1921_p11, %p242_p13 }
  0x2c   : > { %s2667_s13 = sand.u32 (!%p243_p1), 1, %s2500_s19  }
  0x2d   : > { %246 = sbr.rel (%p243_p1) target bundleno = 820 (0x334), region = 40  ;;  %s1922_s23 = sshll.u32 (!%p243_p1), %s2667_s13, 9 }
  0x2e   : > { %s249_s17 = scalar_lea.sflag (!%p243_p1), [#allocation4], %s2667_s13  ;;  %s2671_s26 = scalar_lea.vmem (!%p243_p1), [#allocation3], %s1922_s23 }
  0x32   : > { %2487 = dma.done.wait (%p2630_p8), %s249_s17, 8192  }
  0x33   : > { %2489 = vsyncadd (%p2630_p8), %s249_s17, 4294959104  ;;  %s1924_s28 = sshll.u32 %s2508_s21, 4  ;;  %p290_p0 = scmp.lt.s32.totalorder %s2512_s22, 1 }
  0x34   : > { %p292_p2 = scmp.lt.s32.totalorder %s1924_s28, 31  ;;  %s2685_s18 = scalar_lea.vmem [#allocation6], %s1922_s23 }
  0x35   : > { %s291_s27 = scalar_select %p290_p0, %s2512_s22, 1 }
  0x36   : > { %s3514_s28 = smov (!%p292_p2, %s1924_s28), 31  ;;  %p1927_p8 = scmp.ne.s32.totalorder %s2508_s21, 0 }
  0x37   : > { %s1925_s6 = sshll.u32 %s291_s27, 5 }
  0x38   : > { %s295_s10 = sadd.s32 %s1925_s6, %s3514_s28  ;;  %303 = sbr.rel (%p1927_p8) target bundleno = 65 (0x41), region = 48 }
  0x39   : > { %s1926_s11 = sshll.u32 %s295_s10, 3 }
  0x3a   : > { %s2683_s16 = scalar_lea.vmem %s3480_s1, %s1926_s11 }
  0x3d   : > { %v304_v0 = vlaneseq  ;;  %v2529_v1 = vmov 0.0  }
  0x3f   : > { %vm306_vm0 = vcmp.lt.s32.totalorder %v304_v0, 512 }
  0x40   : > { %308 = vst.msk [vmem:[#allocation2] sm:$0xf] %vm306_vm0, %v2529_v1 }
  0x41 PF: > { %v2689_v2 = vld [vmem:[%s2683_s16 + $0x78] sm:$0xff]  ;;  %v2692_v3 = vld [vmem:[%s2683_s16 + $0x70] sm:$0xff]  ;;  %v2530_v4 = vmov 1   ;;  %v2531_v5 = vmov 0   ;;  %v386_v6 = vld [vmem:[%s2683_s16 + $0x68] sm:$0xff]  ;;  %v2532_v20 = vmov 3  }
  0x42   : > { %2381 = vset.pattern.permute.xlu1 %v2530_v4  ;;  %2379 = vset.pattern.permute.xlu0 %v2530_v4  ;;  %v385_v7 = vld [vmem:[%s2683_s16 + $0x60] sm:$0xff]  ;;  %v384_v8 = vld [vmem:[%s2683_s16 + $0x58] sm:$0xff]  ;;  %v383_v9 = vld [vmem:[%s2683_s16 + $0x50] sm:$0xff]  ;;  %v2533_v21 = vmov 2   ;;  %v2534_v22 = vmov 0.0   ;;  %s1937_s8 = sshll.u32 %s2508_s21, 6 }
  0x43   : > { %546 = vperm.xlu0 %2379, %v2689_v2   ;;  %542 = vperm.xlu1 %2381, %v2692_v3   ;;  %v382_v10 = vld [vmem:[%s2683_s16 + $0x48] sm:$0xff]  ;;  %v381_v11 = vld [vmem:[%s2683_s16 + $0x40] sm:$0xff]  ;;  %v380_v12 = vld [vmem:[%s2683_s16 + $0x38] sm:$0xff]  ;;  %s1932_s7 = sshll.u32 %s2512_s22, 7  ;;  %s1804_s17 = sshll.u32 %s2685_s18, 4  ;;  %s3422_s17 = int_to_ptr.vmem [resolvable:$true] %s1804_s17 }
  0x44   : > { %v379_v13 = vld [vmem:[%s2683_s16 + $0x30] sm:$0xff]  ;;  %v2707_v14 = vld [vmem:[%s2683_s16 + $0x28] sm:$0xff]  ;;  %v2712_v15 = vld [vmem:[%s2683_s16 + $0x20] sm:$0xff]  ;;  %827 = vmatprep.mubr.f32.mxu0 %v2534_v22  ;;  %988 = vmatprep.mubr.f32.mxu1 %v2534_v22  ;;  %s1801_s29 = sadd.s32 %s1937_s8, %s1932_s7  ;;  %s2428_s27 = scalar_lea.vmem %s3422_s17, 8192 }
  0x45   : > { %v2717_v16 = vld [vmem:[%s2683_s16 + $0x18] sm:$0xff]  ;;  %v2722_v17 = vld [vmem:[%s2683_s16 + $0x10] sm:$0xff]  ;;  %v2727_v18 = vld [vmem:[%s2683_s16 + $0x8] sm:$0xff]  ;;  %s1933_s23 = sshll.u32 %s1801_s29, 7  ;;  %p2429_p4 = scmp.ne.s32.totalorder %s3422_s17, %s2428_s27 }
  0x46   : > { %v2732_v19 = vld [vmem:[%s2683_s16] sm:$0xff]  ;;  %v370_v23 = vld [vmem:[%s2671_s26 + $0x1e8] sm:$0xff]  ;;  %s3420_s28 = scalar_lea.hbm %s3484_s5, %s1933_s23  ;;  %s2536_s6 = smov [#allocation6]  }
  0x47   : > { %2380 = vset.pattern.permute.xlu0 %v2531_v5  ;;  %2382 = vset.pattern.permute.xlu1 %v2531_v5  ;;  %v369_v27 = vld [vmem:[%s2671_s26 + $0x1e0] sm:$0xff]  ;;  %v366_v28 = vld [vmem:[%s2671_s26 + $0x1c8] sm:$0xff]  ;;  %p2430_p5 = pnand %p2429_p4, %p2634_p9  ;;  %s2432_s10 = sshll.u32 %s2536_s6, 4  ;;  %s2433_s10 = int_to_ptr.vmem [resolvable:$false] %s2432_s10 }
  0x48   : > { %466 = vperm.xlu0 %2380, %v2689_v2   ;;  %461 = vperm.xlu1 %2382, %v2692_v3   ;;  %v365_v31 = vld [vmem:[%s2671_s26 + $0x1c0] sm:$0xff]  ;;  %v362_v36 = vld [vmem:[%s2671_s26 + $0x1a8] sm:$0xff]  ;;  %s2434_s11 = scalar_lea.vmem %s2433_s10, 16384  ;;  %p2435_p6 = scmp.lt.s32.totalorder %s3422_s17, %s2433_s10 }
  0x49   : > { %v361_v34 = vld [vmem:[%s2671_s26 + $0x1a0] sm:$0xff]  ;;  %v358_v42 = vld [vmem:[%s2671_s26 + $0x188] sm:$0xff]  ;;  %p2431_p3 = pneg %p2430_p5  ;;  %p2436_p7 = scmp.lt.s32.totalorder %s2434_s11, %s2428_s27 }
  0x4a   : > { %v357_v41 = vld [vmem:[%s2671_s26 + $0x180] sm:$0xff]  ;;  %v354_v48 = vld [vmem:[%s2671_s26 + $0x168] sm:$0xff] }
  0x4b   : > { %v353_v47 = vld [vmem:[%s2671_s26 + $0x160] sm:$0xff]  ;;  %v350_v54 = vld [vmem:[%s2671_s26 + $0x148] sm:$0xff]  ;;  %p2437_p10 = por %p2436_p7, %p2435_p6 }
  0x4c   : > { %2383 = vset.pattern.permute.xlu1 %v2530_v4  ;;  %456 = vperm.xlu0 %2380, %v386_v6   ;;  %v349_v53 = vld [vmem:[%s2671_s26 + $0x140] sm:$0xff]  ;;  %v346_v60 = vld [vmem:[%s2671_s26 + $0x128] sm:$0xff] }
  0x4d   : > { %538 = vperm.xlu1 %2383, %v386_v6   ;;  %v345_v59 = vld [vmem:[%s2671_s26 + $0x120] sm:$0xff]  ;;  %p2438_p11 = pnand %p2437_p10, %p2431_p3 }
  0x4e   : > { %v341_v1 = vld [vmem:[%s2671_s26 + $0x100] sm:$0xff] }
  0x50   : > { %451 = vperm.xlu0 %2380, %v385_v7  }
  0x51   : > { %534 = vperm.xlu1 %2383, %v385_v7  }
  0x54   : > { %446 = vperm.xlu0 %2380, %v384_v8  }
  0x55   : > { %530 = vperm.xlu1 %2383, %v384_v8  }
  0x58   : > { %441 = vperm.xlu0 %2380, %v383_v9  }
  0x59   : > { %526 = vperm.xlu1 %2383, %v383_v9  }
  0x5c   : > { %436 = vperm.xlu0 %2380, %v382_v10  }
  0x5d   : > { %522 = vperm.xlu1 %2383, %v382_v10  }
  0x60   : > { %431 = vperm.xlu0 %2380, %v381_v11  }
  0x61   : > { %518 = vperm.xlu1 %2383, %v381_v11  }
  0x64   : > { %426 = vperm.xlu0 %2380, %v380_v12  }
  0x65   : > { %514 = vperm.xlu1 %2383, %v380_v12  }
  0x68   : > { %421 = vperm.xlu0 %2380, %v379_v13  }
  0x69   : > { %510 = vperm.xlu1 %2383, %v379_v13  }
  0x6c   : > { %416 = vperm.xlu0 %2380, %v2707_v14  }
  0x6d   : > { %506 = vperm.xlu1 %2383, %v2707_v14  }
  0x70   : > { %411 = vperm.xlu0 %2380, %v2712_v15  }
  0x71   : > { %502 = vperm.xlu1 %2383, %v2712_v15  }
  0x74   : > { %406 = vperm.xlu0 %2380, %v2717_v16  }
  0x75   : > { %498 = vperm.xlu1 %2383, %v2717_v16  }
  0x78   : > { %401 = vperm.xlu0 %2380, %v2722_v17  }
  0x79   : > { %494 = vperm.xlu1 %2383, %v2722_v17  }
  0x7c   : > { %396 = vperm.xlu0 %2380, %v2727_v18  }
  0x7d   : > { %490 = vperm.xlu1 %2383, %v2727_v18  }
  0x80   : > { %391 = vperm.xlu0 %2380, %v2732_v19  }
  0x81   : > { %486 = vperm.xlu1 %2383, %v2732_v19  }
  0x84   : > { %2386 = vset.pattern.permute.xlu0 %v2532_v20 }
  0x85   : > { %698 = vperm.xlu0 %2386, %v386_v6   ;;  %2384 = vset.pattern.permute.xlu1 %v2532_v20 }
  0x86   : > { %706 = vperm.xlu1 %2384, %v2689_v2  }
  0x89   : > { %686 = vperm.xlu0 %2386, %v383_v9  }
  0x8a   : > { %702 = vperm.xlu1 %2384, %v2692_v3  }
  0x8d   : > { %2389 = vset.pattern.permute.xlu0 %v2533_v21 }
  0x8e   : > { %626 = vperm.xlu0 %2389, %v2689_v2   ;;  %2385 = vset.pattern.permute.xlu1 %v2533_v21  ;;  %v342_v2 = vld [vmem:[%s2671_s26 + $0x108] sm:$0xff] }
  0x8f   : > { %622 = vperm.xlu1 %2385, %v2692_v3  }
  0x92   : > { %614 = vperm.xlu0 %2389, %v385_v7  }
  0x93   : > { %618 = vperm.xlu1 %2385, %v386_v6  }
  0x96   : > { %602 = vperm.xlu0 %2389, %v382_v10  }
  0x97   : > { %2387 = vset.pattern.permute.xlu1 %v2532_v20 }
  0x98   : > { %694 = vperm.xlu1 %2387, %v385_v7   ;;  %v337_v7 = vld [vmem:[%s2671_s26 + $0xe0] sm:$0xff] }
  0x9a   : > { %590 = vperm.xlu0 %2389, %v379_v13  }
  0x9c   : > { %690 = vperm.xlu1 %2387, %v384_v8  }
  0x9e   : > { %578 = vperm.xlu0 %2389, %v2717_v16  }
  0xa0   : > { %2388 = vset.pattern.permute.xlu1 %v2533_v21 }
  0xa1   : > { %610 = vperm.xlu1 %2388, %v384_v8   ;;  %v338_v8 = vld [vmem:[%s2671_s26 + $0xe8] sm:$0xff] }
  0xa2   : > { %2395 = vset.pattern.permute.xlu0 %v2532_v20 }
  0xa3   : > { %674 = vperm.xlu0 %2395, %v380_v12  }
  0xa5   : > { %606 = vperm.xlu1 %2388, %v383_v9  }
  0xa7   : > { %662 = vperm.xlu0 %2395, %v2712_v15  }
  0xa9   : > { %2390 = vset.pattern.permute.xlu1 %v2532_v20 }
  0xaa   : > { %682 = vperm.xlu1 %2390, %v382_v10  }
  0xab   : > { %650 = vperm.xlu0 %2395, %v2727_v18  }
  0xae   : > { %678 = vperm.xlu1 %2390, %v381_v11  }
  0xaf   : > { %2398 = vset.pattern.permute.xlu0 %v2533_v21 }
  0xb0   : > { %566 = vperm.xlu0 %2398, %v2732_v19  }
  0xb2   : > { %2391 = vset.pattern.permute.xlu1 %v2533_v21 }
  0xb3   : > { %598 = vperm.xlu1 %2391, %v381_v11  }
  0xb4   : > { %2399 = vset.pattern.permute.xlu0 %v2532_v20 }
  0xb7   : > { %594 = vperm.xlu1 %2391, %v380_v12  }
  0xbb   : > { %2392 = vset.pattern.permute.xlu1 %v2532_v20 }
  0xbc   : > { %670 = vperm.xlu1 %2392, %v379_v13   ;;  %v333_v13 = vld [vmem:[%s2671_s26 + $0xc0] sm:$0xff] }
  0xbe   : > { %v543_v24 = vpop.permute.xlu1 %542  ;;  %v547_v25 = vpop.permute.xlu0 %546 }
  0xbf   : > { %v564_v26 = vmul.f32 %v547_v25, %v370_v23  ;;  %v563_v33 = vmul.f32 %v543_v24, %v366_v28 }
  0xc0   : > { %666 = vperm.xlu1 %2392, %v2707_v14  }
  0xc1   : > { %763 = vmatprep.subr.mxu0 %v564_v26  ;;  %v325_v26 = vld [vmem:[%s2671_s26 + $0x80] sm:$0xff] }
  0xc3   : > { %v467_v29 = vpop.permute.xlu0 %466  ;;  %v462_v30 = vpop.permute.xlu1 %461 }
  0xc4   : > { %v484_v32 = vmul.f32 %v467_v29, %v369_v27  ;;  %2393 = vset.pattern.permute.xlu1 %v2533_v21  ;;  %v483_v35 = vmul.f32 %v462_v30, %v365_v31  ;;  %v326_v27 = vld [vmem:[%s2671_s26 + $0x88] sm:$0xff] }
  0xc5   : > { %586 = vperm.xlu1 %2393, %v2707_v14   ;;  %v334_v14 = vld [vmem:[%s2671_s26 + $0xc8] sm:$0xff] }
  0xc6   : > { %764 = vmatpush1.msra.mxu0 %v484_v32  ;;  %v321_v32 = vld [vmem:[%s2671_s26 + $0x60] sm:$0xff] }
  0xc7   : > { %v457_v37 = vpop.permute.xlu0 %456  ;;  %765 = vmatprep.subr.mxu0 %v563_v33  ;;  %v322_v33 = vld [vmem:[%s2671_s26 + $0x68] sm:$0xff] }
  0xc8   : > { %v482_v38 = vmul.f32 %v457_v37, %v361_v34  ;;  %v539_v39 = vpop.permute.xlu1 %538  ;;  %766 = vmatpush1.msra.mxu0 %v483_v35 }
  0xc9   : > { %v562_v40 = vmul.f32 %v539_v39, %v362_v36  ;;  %582 = vperm.xlu1 %2393, %v2712_v15  }
  0xcb   : > { %v452_v43 = vpop.permute.xlu0 %451  ;;  %767 = vmatprep.subr.mxu0 %v562_v40  ;;  %v317_v40 = vld [vmem:[%s2671_s26 + $0x40] sm:$0xff] }
  0xcc   : > { %v481_v44 = vmul.f32 %v452_v43, %v357_v41  ;;  %v535_v45 = vpop.permute.xlu1 %534  ;;  %768 = vmatpush1.msra.mxu0 %v482_v38  ;;  %v318_v38 = vld [vmem:[%s2671_s26 + $0x48] sm:$0xff] }
  0xcd   : > { %v561_v46 = vmul.f32 %v535_v45, %v358_v42  ;;  %2394 = vset.pattern.permute.xlu1 %v2532_v20 }
  0xce   : > { %658 = vperm.xlu1 %2394, %v2717_v16  }
  0xcf   : > { %v447_v49 = vpop.permute.xlu0 %446  ;;  %769 = vmatprep.subr.mxu0 %v561_v46  ;;  %v313_v46 = vld [vmem:[%s2671_s26 + $0x20] sm:$0xff] }
  0xd0   : > { %v480_v50 = vmul.f32 %v447_v49, %v353_v47  ;;  %v531_v51 = vpop.permute.xlu1 %530  ;;  %770 = vmatpush1.msra.mxu0 %v481_v44  ;;  %v314_v44 = vld [vmem:[%s2671_s26 + $0x28] sm:$0xff] }
  0xd1   : > { %v560_v52 = vmul.f32 %v531_v51, %v354_v48 }
  0xd2   : > { %654 = vperm.xlu1 %2394, %v2722_v17  }
  0xd3   : > { %v442_v55 = vpop.permute.xlu0 %441  ;;  %771 = vmatprep.subr.mxu0 %v560_v52  ;;  %v309_v52 = vld [vmem:[%s2671_s26] sm:$0xff] }
  0xd4   : > { %v479_v56 = vmul.f32 %v442_v55, %v349_v53  ;;  %v527_v57 = vpop.permute.xlu1 %526  ;;  %772 = vmatpush1.msra.mxu0 %v480_v50  ;;  %v310_v50 = vld [vmem:[%s2671_s26 + $0x8] sm:$0xff] }
  0xd5   : > { %v559_v58 = vmul.f32 %v527_v57, %v350_v54  ;;  %v372_v57 = vld [vmem:[%s2671_s26 + $0x1f8] sm:$0xff] }
  0xd6   : > { %2396 = vset.pattern.permute.xlu1 %v2533_v21  ;;  %v329_v21 = vld [vmem:[%s2671_s26 + $0xa0] sm:$0xff] }
  0xd7   : > { %v437_v61 = vpop.permute.xlu0 %436  ;;  %574 = vperm.xlu1 %2396, %v2722_v17   ;;  %773 = vmatprep.subr.mxu0 %v559_v58 }
  0xd8   : > { %v478_v62 = vmul.f32 %v437_v61, %v345_v59  ;;  %v523_v63 = vpop.permute.xlu1 %522  ;;  %774 = vmatpush1.msra.mxu0 %v479_v56  ;;  %v2805_v56 = vld [vmem:[%s3481_s2] sm:$0xff]  ;;  %v2813_v61 = vld [vmem:[%s3481_s2 + $0x8] sm:$0xff] }
  0xd9   : > { %v558_v0 = vmul.f32 %v523_v63, %v346_v60 }
  0xdb   : > { %v432_v3 = vpop.permute.xlu0 %431  ;;  %570 = vperm.xlu1 %2396, %v2727_v18   ;;  %775 = vmatprep.subr.mxu0 %v558_v0  ;;  %v2820_v0 = vld [vmem:[%s3481_s2 + $0x10] sm:$0xff] }
  0xdc   : > { %v477_v4 = vmul.f32 %v432_v3, %v341_v1  ;;  %v519_v5 = vpop.permute.xlu1 %518  ;;  %776 = vmatpush1.msra.mxu0 %v478_v62  ;;  %v371_v1 = vld [vmem:[%s2671_s26 + $0x1f0] sm:$0xff]  ;;  %v368_v3 = vld [vmem:[%s2671_s26 + $0x1d8] sm:$0xff] }
  0xdd   : > { %v557_v6 = vmul.f32 %v519_v5, %v342_v2  ;;  %v364_v2 = vld [vmem:[%s2671_s26 + $0x1b8] sm:$0xff] }
  0xdf   : > { %v427_v9 = vpop.permute.xlu0 %426  ;;  %2397 = vset.pattern.permute.xlu1 %v2532_v20  ;;  %777 = vmatprep.subr.mxu0 %v557_v6  ;;  %v330_v20 = vld [vmem:[%s2671_s26 + $0xa8] sm:$0xff] }
  0xe0   : > { %v476_v10 = vmul.f32 %v427_v9, %v337_v7  ;;  %v515_v11 = vpop.permute.xlu1 %514  ;;  %646 = vperm.xlu1 %2397, %v2732_v19   ;;  %778 = vmatpush1.msra.mxu0 %v477_v4  ;;  %v367_v4 = vld [vmem:[%s2671_s26 + $0x1d0] sm:$0xff] }
  0xe1   : > { %v556_v12 = vmul.f32 %v515_v11, %v338_v8  ;;  %v2831_v8 = vld [vmem:[%s3481_s2 + $0x18] sm:$0xff] }
  0xe3   : > { %v422_v15 = vpop.permute.xlu0 %421  ;;  %779 = vmatprep.subr.mxu0 %v556_v12  ;;  %v363_v12 = vld [vmem:[%s2671_s26 + $0x1b0] sm:$0xff] }
  0xe4   : > { %v475_v16 = vmul.f32 %v422_v15, %v333_v13  ;;  %v511_v17 = vpop.permute.xlu1 %510  ;;  %780 = vmatpush1.msra.mxu0 %v476_v10 }
  0xe5   : > { %v555_v18 = vmul.f32 %v511_v17, %v334_v14  ;;  %v2839_v14 = vld [vmem:[%s3481_s2 + $0x20] sm:$0xff]  ;;  %v359_v17 = vld [vmem:[%s2671_s26 + $0x190] sm:$0xff] }
  0xe7   : > { %v417_v23 = vpop.permute.xlu0 %416  ;;  %781 = vmatprep.subr.mxu0 %v555_v18  ;;  %v360_v18 = vld [vmem:[%s2671_s26 + $0x198] sm:$0xff] }
  0xe8   : > { %v474_v24 = vmul.f32 %v417_v23, %v329_v21  ;;  %v507_v19 = vpop.permute.xlu1 %506  ;;  %782 = vmatpush1.msra.mxu0 %v475_v16  ;;  %v2848_v21 = vld [vmem:[%s3481_s2 + $0x28] sm:$0xff] }
  0xe9   : > { %v554_v25 = vmul.f32 %v507_v19, %v330_v20  ;;  %v356_v19 = vld [vmem:[%s2671_s26 + $0x178] sm:$0xff] }
  0xeb   : > { %v412_v28 = vpop.permute.xlu0 %411  ;;  %783 = vmatprep.subr.mxu0 %v554_v25  ;;  %v2856_v25 = vld [vmem:[%s3481_s2 + $0x30] sm:$0xff] }
  0xec   : > { %v473_v29 = vmul.f32 %v412_v28, %v325_v26  ;;  %v503_v30 = vpop.permute.xlu1 %502  ;;  %784 = vmatpush1.msra.mxu0 %v474_v24  ;;  %v352_v28 = vld [vmem:[%s2671_s26 + $0x158] sm:$0xff] }
  0xed   : > { %v553_v31 = vmul.f32 %v503_v30, %v326_v27  ;;  %v355_v30 = vld [vmem:[%s2671_s26 + $0x170] sm:$0xff] }
  0xef   : > { %v407_v34 = vpop.permute.xlu0 %406  ;;  %785 = vmatprep.subr.mxu0 %v553_v31  ;;  %v2865_v31 = vld [vmem:[%s3481_s2 + $0x38] sm:$0xff] }
  0xf0   : > { %v472_v35 = vmul.f32 %v407_v34, %v321_v32  ;;  %v499_v36 = vpop.permute.xlu1 %498  ;;  %786 = vmatpush1.msra.mxu0 %v473_v29 }
  0xf1   : > { %v552_v37 = vmul.f32 %v499_v36, %v322_v33  ;;  %v2873_v36 = vld [vmem:[%s3481_s2 + $0x40] sm:$0xff] }
  0xf3   : > { %v402_v39 = vpop.permute.xlu0 %401  ;;  %787 = vmatprep.subr.mxu0 %v552_v37 }
  0xf4   : > { %v495_v41 = vpop.permute.xlu1 %494  ;;  %788 = vmatpush1.msra.mxu0 %v472_v35  ;;  %v471_v43 = vmul.f32 %v402_v39, %v317_v40  ;;  %v351_v35 = vld [vmem:[%s2671_s26 + $0x150] sm:$0xff] }
  0xf5   : > { %v551_v42 = vmul.f32 %v495_v41, %v318_v38  ;;  %v347_v40 = vld [vmem:[%s2671_s26 + $0x130] sm:$0xff]  ;;  %v2881_v41 = vld [vmem:[%s3481_s2 + $0x48] sm:$0xff] }
  0xf7   : > { %v397_v45 = vpop.permute.xlu0 %396  ;;  %789 = vmatprep.subr.mxu0 %v551_v42  ;;  %v348_v42 = vld [vmem:[%s2671_s26 + $0x138] sm:$0xff] }
  0xf8   : > { %v491_v47 = vpop.permute.xlu1 %490  ;;  %790 = vmatpush1.msra.mxu0 %v471_v43  ;;  %v470_v49 = vmul.f32 %v397_v45, %v313_v46 }
  0xf9   : > { %v550_v48 = vmul.f32 %v491_v47, %v314_v44  ;;  %v2891_v47 = vld [vmem:[%s3481_s2 + $0x50] sm:$0xff] }
  0xfb   : > { %v392_v51 = vpop.permute.xlu0 %391  ;;  %791 = vmatprep.subr.mxu0 %v550_v48  ;;  %v344_v48 = vld [vmem:[%s2671_s26 + $0x118] sm:$0xff] }
  0xfc   : > { %v487_v53 = vpop.permute.xlu1 %486  ;;  %792 = vmatpush1.msra.mxu0 %v470_v49  ;;  %v469_v55 = vmul.f32 %v392_v51, %v309_v52  ;;  %v2899_v51 = vld [vmem:[%s3481_s2 + $0x58] sm:$0xff] }
  0xfd   : > { %v549_v54 = vmul.f32 %v487_v53, %v310_v50  ;;  %v340_v53 = vld [vmem:[%s2671_s26 + $0xf8] sm:$0xff] }
  0xff   : > { %793 = vmatprep.subr.mxu0 %v549_v54  ;;  %v343_v54 = vld [vmem:[%s2671_s26 + $0x110] sm:$0xff] }
 0x100   : > { %794 = vmatpush1.msra.mxu0 %v469_v55  ;;  %v699_v58 = vpop.permute.xlu0 %698 }
 0x101   : > { %v707_v59 = vpop.permute.xlu1 %706  ;;  %828 = vmatmul.mubr.f32.vlgmr.msra.gmra.mxu0 %v2805_v56  ;;  %v722_v9 = vmul.f32 %v699_v58, %v364_v2  ;;  %v2908_v58 = vld [vmem:[%s3481_s2 + $0x60] sm:$0xff]  ;;  %v335_v2 = vld [vmem:[%s2671_s26 + $0xd0] sm:$0xff] }
 0x102   : > { %v724_v60 = vmul.f32 %v707_v59, %v372_v57  ;;  %833 = vmatprep.mubr.f32.mxu0 %v2534_v22 }
 0x104   : > { %924 = vmatprep.subr.mxu1 %v724_v60  ;;  %v687_v62 = vpop.permute.xlu0 %686  ;;  %v339_v60 = vld [vmem:[%s2671_s26 + $0xf0] sm:$0xff] }
 0x105   : > { %v703_v63 = vpop.permute.xlu1 %702  ;;  %834 = vmatmul.mubr.f32.gmra.mxu0 %v2813_v61  ;;  %v719_v32 = vmul.f32 %v687_v62, %v352_v28  ;;  %v324_v28 = vld [vmem:[%s2671_s26 + $0x78] sm:$0xff] }
 0x106   : > { %839 = vmatprep.mubr.f32.mxu0 %v2534_v22  ;;  %v723_v10 = vmul.f32 %v703_v63, %v368_v3  ;;  %v2916_v63 = vld [vmem:[%s3481_s2 + $0x68] sm:$0xff]  ;;  %v336_v3 = vld [vmem:[%s2671_s26 + $0xd8] sm:$0xff] }
 0x109   : > { %v627_v5 = vpop.permute.xlu0 %626  ;;  %840 = vmatmul.mubr.f32.gmra.mxu0 %v2820_v0 }
 0x10a   : > { %v644_v6 = vmul.f32 %v627_v5, %v371_v1  ;;  %v623_v7 = vpop.permute.xlu1 %622  ;;  %845 = vmatprep.mubr.f32.mxu0 %v2534_v22 }
 0x10b   : > { %v643_v11 = vmul.f32 %v623_v7, %v367_v4  ;;  %v2925_v4 = vld [vmem:[%s3481_s2 + $0x70] sm:$0xff] }
 0x10c   : > { %925 = vmatpush1.msra.mxu1 %v644_v6 }
 0x10d   : > { %926 = vmatprep.subr.mxu1 %v723_v10  ;;  %846 = vmatmul.mubr.f32.gmra.mxu0 %v2831_v8  ;;  %v615_v16 = vpop.permute.xlu0 %614  ;;  %v2933_v10 = vld [vmem:[%s3481_s2 + $0x78] sm:$0xff] }
 0x10e   : > { %v619_v13 = vpop.permute.xlu1 %618  ;;  %927 = vmatpush1.msra.mxu1 %v643_v11  ;;  %851 = vmatprep.mubr.f32.mxu0 %v2534_v22  ;;  %v641_v23 = vmul.f32 %v615_v16, %v359_v17  ;;  %v331_v16 = vld [vmem:[%s2671_s26 + $0xb0] sm:$0xff] }
 0x10f   : > { %v642_v15 = vmul.f32 %v619_v13, %v363_v12  ;;  %928 = vmatprep.subr.mxu1 %v722_v9  ;;  %v332_v9 = vld [vmem:[%s2671_s26 + $0xb8] sm:$0xff] }
 0x111   : > { %929 = vmatpush1.msra.mxu1 %v642_v15  ;;  %852 = vmatmul.mubr.f32.gmra.mxu0 %v2839_v14  ;;  %v603_v29 = vpop.permute.xlu0 %602  ;;  %v328_v15 = vld [vmem:[%s2671_s26 + $0x98] sm:$0xff] }
 0x112   : > { %857 = vmatprep.mubr.f32.mxu0 %v2534_v22  ;;  %v638_v43 = vmul.f32 %v603_v29, %v347_v40  ;;  %v323_v29 = vld [vmem:[%s2671_s26 + $0x70] sm:$0xff] }
 0x113   : > { %v695_v20 = vpop.permute.xlu1 %694 }
 0x114   : > { %v721_v24 = vmul.f32 %v695_v20, %v360_v18 }
 0x115   : > { %858 = vmatmul.mubr.f32.gmra.mxu0 %v2848_v21  ;;  %v591_v37 = vpop.permute.xlu0 %590 }
 0x116   : > { %930 = vmatprep.subr.mxu1 %v721_v24  ;;  %863 = vmatprep.mubr.f32.mxu0 %v2534_v22  ;;  %v635_v5 = vmul.f32 %v591_v37, %v335_v2  ;;  %v2942_v24 = vld [vmem:[%s3482_s3 + $0x78] sm:$0xff] }
 0x117   : > { %v691_v26 = vpop.permute.xlu1 %690  ;;  %931 = vmatpush1.msra.mxu1 %v641_v23  ;;  %v327_v23 = vld [vmem:[%s2671_s26 + $0x90] sm:$0xff]  ;;  %2066 = vmatprep.subr.mxu0 %v2942_v24  ;;  %v320_v37 = vld [vmem:[%s2671_s26 + $0x58] sm:$0xff] }
 0x118   : > { %v720_v27 = vmul.f32 %v691_v26, %v356_v19  ;;  %2067 = vmatpush3.msra.mxu0 %v2942_v24  ;;  %v312_v2 = vld [vmem:[%s2671_s26 + $0x18] sm:$0xff] }
 0x119   : > { %864 = vmatmul.mubr.f32.gmra.mxu0 %v2856_v25  ;;  %v2884_v45 = vpop.permute.xlu0 %578 }
 0x11a   : > { %932 = vmatprep.subr.mxu1 %v720_v27  ;;  %869 = vmatprep.mubr.f32.mxu0 %v2534_v22  ;;  %v2949_v27 = vld [vmem:[%s3482_s3 + $0x70] sm:$0xff] }
 0x11b   : > { %2068 = vmatprep.subr.mxu0 %v2949_v27 }
 0x11c   : > { %v611_v33 = vpop.permute.xlu1 %610  ;;  %2069 = vmatpush3.msra.mxu0 %v2949_v27 }
 0x11d   : > { %v640_v34 = vmul.f32 %v611_v33, %v355_v30  ;;  %870 = vmatmul.mubr.f32.gmra.mxu0 %v2865_v31  ;;  %v2958_v30 = vld [vmem:[%s3482_s3 + $0x68] sm:$0xff] }
 0x11e   : > { %875 = vmatprep.mubr.f32.mxu0 %v2534_v22  ;;  %v675_v52 = vpop.permute.xlu0 %674  ;;  %2070 = vmatprep.subr.mxu0 %v2958_v30 }
 0x11f   : > { %933 = vmatpush1.msra.mxu1 %v640_v34  ;;  %v716_v57 = vmul.f32 %v675_v52, %v340_v53  ;;  %2071 = vmatpush3.msra.mxu0 %v2958_v30  ;;  %v2965_v34 = vld [vmem:[%s3482_s3 + $0x60] sm:$0xff]  ;;  %v315_v53 = vld [vmem:[%s2671_s26 + $0x30] sm:$0xff] }
 0x120   : > { %v607_v38 = vpop.permute.xlu1 %606  ;;  %934 = vmatprep.subr.mxu1 %v719_v32  ;;  %2072 = vmatprep.subr.mxu0 %v2965_v34 }
 0x121   : > { %v639_v39 = vmul.f32 %v607_v38, %v351_v35  ;;  %876 = vmatmul.mubr.f32.gmra.mxu0 %v2873_v36  ;;  %v632_v35 = vmul.f32 %v2884_v45, %v323_v29  ;;  %v2974_v38 = vld [vmem:[%s3482_s3 + $0x58] sm:$0xff] }
 0x122   : > { %881 = vmatprep.mubr.f32.mxu0 %v2534_v22  ;;  %v663_v13 = vpop.permute.xlu0 %662  ;;  %2073 = vmatpush3.msra.mxu0 %v2965_v34 }
 0x123   : > { %935 = vmatpush1.msra.mxu1 %v639_v39  ;;  %v713_v18 = vmul.f32 %v663_v13, %v328_v15  ;;  %2074 = vmatprep.subr.mxu0 %v2974_v38 }
 0x124   : > { %2075 = vmatpush3.msra.mxu0 %v2974_v38 }
 0x125   : > { %v683_v44 = vpop.permute.xlu1 %682  ;;  %882 = vmatmul.mubr.f32.gmra.mxu0 %v2881_v41 }
 0x126   : > { %v718_v46 = vmul.f32 %v683_v44, %v348_v42  ;;  %887 = vmatprep.mubr.f32.mxu0 %v2534_v22  ;;  %v2981_v42 = vld [vmem:[%s3482_s3 + $0x50] sm:$0xff]  ;;  %v2989_v44 = vld [vmem:[%s3482_s3 + $0x48] sm:$0xff]  ;;  %v651_v45 = vpop.permute.xlu0 %650 }
 0x127   : > { %2076 = vmatprep.subr.mxu0 %v2981_v42 }
 0x128   : > { %936 = vmatprep.subr.mxu1 %v718_v46  ;;  %2077 = vmatpush3.msra.mxu0 %v2981_v42  ;;  %v316_v46 = vld [vmem:[%s2671_s26 + $0x38] sm:$0xff] }
 0x129   : > { %v679_v49 = vpop.permute.xlu1 %678  ;;  %937 = vmatpush1.msra.mxu1 %v638_v43  ;;  %888 = vmatmul.mubr.f32.gmra.mxu0 %v2891_v47  ;;  %v319_v43 = vld [vmem:[%s2671_s26 + $0x50] sm:$0xff]  ;;  %v710_v52 = vmul.f32 %v651_v45, %v316_v46 }
 0x12a   : > { %v717_v50 = vmul.f32 %v679_v49, %v344_v48  ;;  %893 = vmatprep.mubr.f32.mxu0 %v2534_v22  ;;  %2078 = vmatprep.subr.mxu0 %v2989_v44  ;;  %v2997_v49 = vld [vmem:[%s3482_s3 + $0x40] sm:$0xff] }
 0x12b   : > { %2079 = vmatpush3.msra.mxu0 %v2989_v44 }
 0x12c   : > { %938 = vmatprep.subr.mxu1 %v717_v50  ;;  %2080 = vmatprep.subr.mxu0 %v2997_v49 }
 0x12d   : > { %894 = vmatmul.mubr.f32.gmra.mxu0 %v2899_v51 }
 0x12e   : > { %v599_v55 = vpop.permute.xlu1 %598  ;;  %899 = vmatprep.mubr.f32.mxu0 %v2534_v22  ;;  %2081 = vmatpush3.msra.mxu0 %v2997_v49 }
 0x12f   : > { %v637_v59 = vmul.f32 %v599_v55, %v343_v54  ;;  %v3005_v54 = vld [vmem:[%s3482_s3 + $0x38] sm:$0xff] }
 0x130   : > { %2082 = vmatprep.subr.mxu0 %v3005_v54 }
 0x131   : > { %939 = vmatpush1.msra.mxu1 %v637_v59  ;;  %900 = vmatmul.mubr.f32.gmra.mxu0 %v2908_v58 }
 0x132   : > { %v595_v62 = vpop.permute.xlu1 %594  ;;  %940 = vmatprep.subr.mxu1 %v716_v57  ;;  %905 = vmatprep.mubr.f32.mxu0 %v2534_v22  ;;  %v3012_v57 = vld [vmem:[%s3482_s3 + $0x30] sm:$0xff] }
 0x133   : > { %v636_v1 = vmul.f32 %v595_v62, %v339_v60  ;;  %2083 = vmatpush3.msra.mxu0 %v3005_v54  ;;  %v567_v60 = vpop.permute.xlu0 %566  ;;  %v311_v62 = vld [vmem:[%s2671_s26 + $0x10] sm:$0xff]  ;;  %s1788_s26 = scalar_lea.sflag [#allocation5], %s2667_s13 }
 0x134   : > { %2084 = vmatprep.subr.mxu0 %v3012_v57 }
 0x135   : > { %941 = vmatpush1.msra.mxu1 %v636_v1  ;;  %906 = vmatmul.mubr.f32.gmra.mxu0 %v2916_v63  ;;  %v3020_v1 = vld [vmem:[%s3482_s3 + $0x28] sm:$0xff] }
 0x136   : > { %911 = vmatprep.mubr.f32.mxu0 %v2534_v22  ;;  %2085 = vmatpush3.msra.mxu0 %v3012_v57 }
 0x137   : > { %v671_v6 = vpop.permute.xlu1 %670  ;;  %2086 = vmatprep.subr.mxu0 %v3020_v1 }
 0x138   : > { %v715_v7 = vmul.f32 %v671_v6, %v336_v3  ;;  %2087 = vmatpush3.msra.mxu0 %v3020_v1  ;;  %v3028_v3 = vld [vmem:[%s3482_s3 + $0x20] sm:$0xff]  ;;  %v629_v6 = vmul.f32 %v567_v60, %v311_v62 }
 0x139   : > { %912 = vmatmul.mubr.f32.gmra.mxu0 %v2925_v4  ;;  %2088 = vmatprep.subr.mxu0 %v3028_v3 }
 0x13a   : > { %942 = vmatprep.subr.mxu1 %v715_v7  ;;  %917 = vmatprep.mubr.f32.mxu0 %v2534_v22 }
 0x13b   : > { %v667_v11 = vpop.permute.xlu1 %666  ;;  %943 = vmatpush1.msra.mxu1 %v635_v5  ;;  %2089 = vmatpush3.msra.mxu0 %v3028_v3 }
 0x13c   : > { %v714_v12 = vmul.f32 %v667_v11, %v332_v9  ;;  %v3035_v9 = vld [vmem:[%s3482_s3 + $0x18] sm:$0xff]  ;;  %v3042_v11 = vld [vmem:[%s3482_s3 + $0x10] sm:$0xff] }
 0x13d   : > { %918 = vmatmul.mubr.f32.gmra.mxu0 %v2933_v10  ;;  %2090 = vmatprep.subr.mxu0 %v3035_v9 }
 0x13e   : > { %944 = vmatprep.subr.mxu1 %v714_v12  ;;  %2091 = vmatpush3.msra.mxu0 %v3035_v9  ;;  %v3050_v12 = vld [vmem:[%s3482_s3 + $0x8] sm:$0xff] }
 0x13f   : > { %2092 = vmatprep.subr.mxu0 %v3042_v11 }
 0x140   : > { %v587_v17 = vpop.permute.xlu1 %586  ;;  %2093 = vmatpush3.msra.mxu0 %v3042_v11 }
 0x141   : > { %v634_v20 = vmul.f32 %v587_v17, %v331_v16  ;;  %2094 = vmatprep.subr.mxu0 %v3050_v12 }
 0x142   : > { %2095 = vmatpush3.msra.mxu0 %v3050_v12 }
 0x143   : > { %945 = vmatpush1.msra.mxu1 %v634_v20 }
 0x144   : > { %v583_v19 = vpop.permute.xlu1 %582  ;;  %946 = vmatprep.subr.mxu1 %v713_v18 }
 0x145   : > { %v633_v26 = vmul.f32 %v583_v19, %v327_v23 }
 0x147   : > { %947 = vmatpush1.msra.mxu1 %v633_v26 }
 0x149   : > { %v659_v32 = vpop.permute.xlu1 %658 }
 0x14a   : > { %v712_v33 = vmul.f32 %v659_v32, %v324_v28 }
 0x14c   : > { %948 = vmatprep.subr.mxu1 %v712_v33 }
 0x14d   : > { %v655_v39 = vpop.permute.xlu1 %654  ;;  %949 = vmatpush1.msra.mxu1 %v632_v35 }
 0x14e   : > { %v711_v40 = vmul.f32 %v655_v39, %v320_v37 }
 0x150   : > { %950 = vmatprep.subr.mxu1 %v711_v40 }
 0x152   : > { %v575_v48 = vpop.permute.xlu1 %574 }
 0x153   : > { %v631_v50 = vmul.f32 %v575_v48, %v319_v43 }
 0x155   : > { %951 = vmatpush1.msra.mxu1 %v631_v50 }
 0x156   : > { %v571_v55 = vpop.permute.xlu1 %570  ;;  %952 = vmatprep.subr.mxu1 %v710_v52 }
 0x157   : > { %v630_v59 = vmul.f32 %v571_v55, %v315_v53 }
 0x159   : > { %953 = vmatpush1.msra.mxu1 %v630_v59 }
 0x15b   : > { %v647_v5 = vpop.permute.xlu1 %646 }
 0x15c   : > { %v709_v7 = vmul.f32 %v647_v5, %v312_v2 }
 0x15e   : > { %954 = vmatprep.subr.mxu1 %v709_v7 }
 0x15f   : > { %955 = vmatpush1.msra.mxu1 %v629_v6 }
 0x160   : > { %989 = vmatmul.mubr.f32.vlgmr.msra.gmra.mxu1 %v2805_v56  ;;  %2122 = vmatprep.subr.mxu1 %v2942_v24  ;;  %v3063_v56 = vld [vmem:[%s3482_s3] sm:$0xff] }
 0x161   : > { %994 = vmatprep.mubr.f32.mxu1 %v2534_v22  ;;  %2123 = vmatpush3.msra.mxu1 %v2942_v24 }
 0x162   : > { %2124 = vmatprep.subr.mxu1 %v2949_v27  ;;  %2096 = vmatprep.subr.mxu0 %v3063_v56 }
 0x163   : > { %2125 = vmatpush3.msra.mxu1 %v2949_v27  ;;  %2097 = vmatpush3.msra.mxu0 %v3063_v56 }
 0x164   : > { %995 = vmatmul.mubr.f32.gmra.mxu1 %v2813_v61  ;;  %2126 = vmatprep.subr.mxu1 %v2958_v30  ;;  %v743_v61 = vlaneseq }
 0x165   : > { %1000 = vmatprep.mubr.f32.mxu1 %v2534_v22  ;;  %2127 = vmatpush3.msra.mxu1 %v2958_v30 }
 0x166   : > { %2128 = vmatprep.subr.mxu1 %v2965_v34  ;;  %2178 = vmatprep.subr.mxu0 %v2942_v24  ;;  %vm1117_vm1 = vcmp.lt.s32.totalorder %v743_v61, 512 }
 0x167   : > { %2129 = vmatpush3.msra.mxu1 %v2965_v34 }
 0x168   : > { %1001 = vmatmul.mubr.f32.gmra.mxu1 %v2820_v0  ;;  %2130 = vmatprep.subr.mxu1 %v2974_v38  ;;  %v3126_v0 = vshrl.u32 %v743_v61, 7 }
 0x169   : > { %1006 = vmatprep.mubr.f32.mxu1 %v2534_v22  ;;  %2131 = vmatpush3.msra.mxu1 %v2974_v38 }
 0x16a   : > { %2132 = vmatprep.subr.mxu1 %v2981_v42 }
 0x16b   : > { %2133 = vmatpush3.msra.mxu1 %v2981_v42 }
 0x16c   : > { %1007 = vmatmul.mubr.f32.gmra.mxu1 %v2831_v8  ;;  %2134 = vmatprep.subr.mxu1 %v2989_v44  ;;  %v745_v8 = vsub.s32 0, %v3126_v0 }
 0x16d   : > { %1012 = vmatprep.mubr.f32.mxu1 %v2534_v22  ;;  %2135 = vmatpush3.msra.mxu1 %v2989_v44 }
 0x16e   : > { %2136 = vmatprep.subr.mxu1 %v2997_v49 }
 0x16f   : > { %2137 = vmatpush3.msra.mxu1 %v2997_v49 }
 0x170   : > { %1013 = vmatmul.mubr.f32.gmra.mxu1 %v2839_v14  ;;  %2138 = vmatprep.subr.mxu1 %v3005_v54  ;;  %v3129_v14 = vld [vmem:[#allocation2] sm:$0xf] }
 0x171   : > { %1018 = vmatprep.mubr.f32.mxu1 %v2534_v22  ;;  %2139 = vmatpush3.msra.mxu1 %v3005_v54 }
 0x172   : > { %2140 = vmatprep.subr.mxu1 %v3012_v57 }
 0x173   : > { %2141 = vmatpush3.msra.mxu1 %v3012_v57 }
 0x174   : > { %1019 = vmatmul.mubr.f32.gmra.mxu1 %v2848_v21  ;;  %2142 = vmatprep.subr.mxu1 %v3020_v1  ;;  %v749_v21 = vsub.s32 1, %v3126_v0 }
 0x175   : > { %1024 = vmatprep.mubr.f32.mxu1 %v2534_v22  ;;  %2143 = vmatpush3.msra.mxu1 %v3020_v1 }
 0x176   : > { %2144 = vmatprep.subr.mxu1 %v3028_v3 }
 0x177   : > { %2145 = vmatpush3.msra.mxu1 %v3028_v3 }
 0x178   : > { %1025 = vmatmul.mubr.f32.gmra.mxu1 %v2856_v25  ;;  %2146 = vmatprep.subr.mxu1 %v3035_v9  ;;  %v3133_v25 = vrot.slane %v3129_v14, %v745_v8 }
 0x179   : > { %1030 = vmatprep.mubr.f32.mxu1 %v2534_v22  ;;  %2147 = vmatpush3.msra.mxu1 %v3035_v9 }
 0x17a   : > { %2148 = vmatprep.subr.mxu1 %v3042_v11 }
 0x17b   : > { %2149 = vmatpush3.msra.mxu1 %v3042_v11 }
 0x17c   : > { %1031 = vmatmul.mubr.f32.gmra.mxu1 %v2865_v31  ;;  %2150 = vmatprep.subr.mxu1 %v3050_v12  ;;  %v3136_v31 = vrot.slane %v3129_v14, %v749_v21 }
 0x17d   : > { %1036 = vmatprep.mubr.f32.mxu1 %v2534_v22  ;;  %2151 = vmatpush3.msra.mxu1 %v3050_v12 }
 0x17e   : > { %2152 = vmatprep.subr.mxu1 %v3063_v56 }
 0x17f   : > { %2153 = vmatpush3.msra.mxu1 %v3063_v56 }
 0x180   : > { %1037 = vmatmul.mubr.f32.gmra.mxu1 %v2873_v36  ;;  %2234 = vmatprep.subr.mxu1 %v2942_v24 }
 0x181   : > { %1042 = vmatprep.mubr.f32.mxu1 %v2534_v22 }
 0x184   : > { %1043 = vmatmul.mubr.f32.gmra.mxu1 %v2881_v41 }
 0x185   : > { %1048 = vmatprep.mubr.f32.mxu1 %v2534_v22 }
 0x188   : > { %1049 = vmatmul.mubr.f32.gmra.mxu1 %v2891_v47 }
 0x189   : > { %1054 = vmatprep.mubr.f32.mxu1 %v2534_v22 }
 0x18c   : > { %1055 = vmatmul.mubr.f32.gmra.mxu1 %v2899_v51 }
 0x18d   : > { %1060 = vmatprep.mubr.f32.mxu1 %v2534_v22 }
 0x190   : > { %1061 = vmatmul.mubr.f32.gmra.mxu1 %v2908_v58 }
 0x191   : > { %1066 = vmatprep.mubr.f32.mxu1 %v2534_v22 }
 0x194   : > { %1067 = vmatmul.mubr.f32.gmra.mxu1 %v2916_v63 }
 0x195   : > { %1072 = vmatprep.mubr.f32.mxu1 %v2534_v22 }
 0x198   : > { %1073 = vmatmul.mubr.f32.gmra.mxu1 %v2925_v4 }
 0x199   : > { %1078 = vmatprep.mubr.f32.mxu1 %v2534_v22 }
 0x19c   : > { %1079 = vmatmul.mubr.f32.gmra.mxu1 %v2933_v10 }
 0x1c1   : > { %v829_v36 = vpop.f32.mrf.mxu0 }
 0x1c2   : > { %v830_v22 = vadd.f32 %v829_v36, %v3133_v25 }
 0x1c3   : > { %v831_v41 = vpop.f32.mrf.mxu0 }
 0x1c4   : > { %v832_v47 = vadd.f32 %v831_v41, %v3136_v31  ;;  %2098 = vmatprep.mubr.f32.mxu0 %v830_v22 }
 0x1c5   : > { %v835_v51 = vpop.f32.mrf.mxu0 }
 0x1c6   : > { %v836_v58 = vadd.f32 %v835_v51, %v3133_v25  ;;  %2154 = vmatprep.mubr.f32.mxu1 %v832_v47 }
 0x1c7   : > { %v837_v63 = vpop.f32.mrf.mxu0 }
 0x1c8   : > { %v838_v4 = vadd.f32 %v837_v63, %v3136_v31  ;;  %2099 = vmatmul.mubr.f32.vlgmr.msra.gmra.mxu0 %v836_v58  ;;  %v753_v63 = vsub.s32 2, %v3126_v0 }
 0x1c9   : > { %v841_v10 = vpop.f32.mrf.mxu0  ;;  %2179 = vmatpush3.msra.mxu0 %v2942_v24 }
 0x1ca   : > { %v842_v13 = vadd.f32 %v841_v10, %v3133_v25  ;;  %2155 = vmatmul.mubr.f32.vlgmr.msra.gmra.mxu1 %v838_v4  ;;  %2180 = vmatprep.subr.mxu0 %v2949_v27  ;;  %v757_v4 = vsub.s32 3, %v3126_v0  ;;  %v3243_v10 = vrot.slane %v3129_v14, %v753_v63  ;;  %v2535_v63 = vmov 1966171168  }
 0x1cb   : > { %v843_v15 = vpop.f32.mrf.mxu0  ;;  %2181 = vmatpush3.msra.mxu0 %v2949_v27  ;;  %2235 = vmatpush3.msra.mxu1 %v2942_v24 }
 0x1cc   : > { %v844_v16 = vadd.f32 %v843_v15, %v3136_v31  ;;  %2101 = vmatprep.mubr.f32.mxu0 %v842_v13  ;;  %2182 = vmatprep.subr.mxu0 %v2958_v30 }
 0x1cd   : > { %v847_v17 = vpop.f32.mrf.mxu0  ;;  %2236 = vmatprep.subr.mxu1 %v2949_v27  ;;  %2183 = vmatpush3.msra.mxu0 %v2958_v30 }
 0x1ce   : > { %v848_v18 = vadd.f32 %v847_v17, %v3133_v25  ;;  %2157 = vmatprep.mubr.f32.mxu1 %v844_v16  ;;  %2237 = vmatpush3.msra.mxu1 %v2949_v27 }
 0x1cf   : > { %v849_v20 = vpop.f32.mrf.mxu0  ;;  %2184 = vmatprep.subr.mxu0 %v2965_v34  ;;  %2238 = vmatprep.subr.mxu1 %v2958_v30 }
 0x1d0   : > { %v850_v23 = vadd.f32 %v849_v20, %v3136_v31  ;;  %2102 = vmatmul.mubr.f32.gmra.mxu0 %v848_v18  ;;  %2239 = vmatpush3.msra.mxu1 %v2958_v30 }
 0x1d1   : > { %v853_v24 = vpop.f32.mrf.mxu0  ;;  %2185 = vmatpush3.msra.mxu0 %v2965_v34  ;;  %2240 = vmatprep.subr.mxu1 %v2965_v34 }
 0x1d2   : > { %v854_v19 = vadd.f32 %v853_v24, %v3133_v25  ;;  %2158 = vmatmul.mubr.f32.gmra.mxu1 %v850_v23  ;;  %2186 = vmatprep.subr.mxu0 %v2974_v38 }
 0x1d3   : > { %v855_v26 = vpop.f32.mrf.mxu0  ;;  %2187 = vmatpush3.msra.mxu0 %v2974_v38  ;;  %2241 = vmatpush3.msra.mxu1 %v2965_v34 }
 0x1d4   : > { %v856_v27 = vadd.f32 %v855_v26, %v3136_v31  ;;  %2104 = vmatprep.mubr.f32.mxu0 %v854_v19  ;;  %2188 = vmatprep.subr.mxu0 %v2981_v42 }
 0x1d5   : > { %v859_v28 = vpop.f32.mrf.mxu0  ;;  %2242 = vmatprep.subr.mxu1 %v2974_v38  ;;  %2189 = vmatpush3.msra.mxu0 %v2981_v42 }
 0x1d6   : > { %v860_v29 = vadd.f32 %v859_v28, %v3133_v25  ;;  %2160 = vmatprep.mubr.f32.mxu1 %v856_v27  ;;  %2243 = vmatpush3.msra.mxu1 %v2974_v38 }
 0x1d7   : > { %v861_v30 = vpop.f32.mrf.mxu0  ;;  %2190 = vmatprep.subr.mxu0 %v2989_v44  ;;  %2244 = vmatprep.subr.mxu1 %v2981_v42 }
 0x1d8   : > { %v862_v32 = vadd.f32 %v861_v30, %v3136_v31  ;;  %2105 = vmatmul.mubr.f32.gmra.mxu0 %v860_v29  ;;  %2245 = vmatpush3.msra.mxu1 %v2981_v42 }
 0x1d9   : > { %v865_v33 = vpop.f32.mrf.mxu0  ;;  %2191 = vmatpush3.msra.mxu0 %v2989_v44  ;;  %2246 = vmatprep.subr.mxu1 %v2989_v44 }
 0x1da   : > { %v866_v34 = vadd.f32 %v865_v33, %v3133_v25  ;;  %2161 = vmatmul.mubr.f32.gmra.mxu1 %v862_v32  ;;  %2192 = vmatprep.subr.mxu0 %v2997_v49 }
 0x1db   : > { %v867_v35 = vpop.f32.mrf.mxu0  ;;  %2193 = vmatpush3.msra.mxu0 %v2997_v49  ;;  %2247 = vmatpush3.msra.mxu1 %v2989_v44 }
 0x1dc   : > { %v868_v37 = vadd.f32 %v867_v35, %v3136_v31  ;;  %2107 = vmatprep.mubr.f32.mxu0 %v866_v34  ;;  %2194 = vmatprep.subr.mxu0 %v3005_v54 }
 0x1dd   : > { %v871_v38 = vpop.f32.mrf.mxu0  ;;  %2248 = vmatprep.subr.mxu1 %v2997_v49  ;;  %2195 = vmatpush3.msra.mxu0 %v3005_v54 }
 0x1de   : > { %v872_v39 = vadd.f32 %v871_v38, %v3133_v25  ;;  %2163 = vmatprep.mubr.f32.mxu1 %v868_v37  ;;  %2249 = vmatpush3.msra.mxu1 %v2997_v49 }
 0x1df   : > { %v873_v40 = vpop.f32.mrf.mxu0  ;;  %2196 = vmatprep.subr.mxu0 %v3012_v57  ;;  %2250 = vmatprep.subr.mxu1 %v3005_v54 }
 0x1e0   : > { %v874_v42 = vadd.f32 %v873_v40, %v3136_v31  ;;  %2108 = vmatmul.mubr.f32.gmra.mxu0 %v872_v39  ;;  %2251 = vmatpush3.msra.mxu1 %v3005_v54 }
 0x1e1   : > { %v877_v43 = vpop.f32.mrf.mxu0  ;;  %2197 = vmatpush3.msra.mxu0 %v3012_v57  ;;  %2252 = vmatprep.subr.mxu1 %v3012_v57 }
 0x1e2   : > { %v878_v44 = vadd.f32 %v877_v43, %v3133_v25  ;;  %2164 = vmatmul.mubr.f32.gmra.mxu1 %v874_v42  ;;  %2198 = vmatprep.subr.mxu0 %v3020_v1 }
 0x1e3   : > { %v879_v45 = vpop.f32.mrf.mxu0  ;;  %2199 = vmatpush3.msra.mxu0 %v3020_v1  ;;  %2253 = vmatpush3.msra.mxu1 %v3012_v57 }
 0x1e4   : > { %v880_v46 = vadd.f32 %v879_v45, %v3136_v31  ;;  %2110 = vmatprep.mubr.f32.mxu0 %v878_v44  ;;  %2200 = vmatprep.subr.mxu0 %v3028_v3 }
 0x1e5   : > { %v883_v48 = vpop.f32.mrf.mxu0  ;;  %2254 = vmatprep.subr.mxu1 %v3020_v1  ;;  %2201 = vmatpush3.msra.mxu0 %v3028_v3 }
 0x1e6   : > { %v884_v49 = vadd.f32 %v883_v48, %v3133_v25  ;;  %2166 = vmatprep.mubr.f32.mxu1 %v880_v46  ;;  %2255 = vmatpush3.msra.mxu1 %v3020_v1 }
 0x1e7   : > { %v885_v50 = vpop.f32.mrf.mxu0  ;;  %2202 = vmatprep.subr.mxu0 %v3035_v9  ;;  %2256 = vmatprep.subr.mxu1 %v3028_v3 }
 0x1e8   : > { %v886_v52 = vadd.f32 %v885_v50, %v3136_v31  ;;  %2111 = vmatmul.mubr.f32.gmra.mxu0 %v884_v49  ;;  %2257 = vmatpush3.msra.mxu1 %v3028_v3 }
 0x1e9   : > { %v889_v53 = vpop.f32.mrf.mxu0  ;;  %2203 = vmatpush3.msra.mxu0 %v3035_v9  ;;  %2258 = vmatprep.subr.mxu1 %v3035_v9 }
 0x1ea   : > { %v890_v54 = vadd.f32 %v889_v53, %v3133_v25  ;;  %2167 = vmatmul.mubr.f32.gmra.mxu1 %v886_v52  ;;  %2204 = vmatprep.subr.mxu0 %v3042_v11 }
 0x1eb   : > { %v891_v55 = vpop.f32.mrf.mxu0  ;;  %2205 = vmatpush3.msra.mxu0 %v3042_v11  ;;  %2259 = vmatpush3.msra.mxu1 %v3035_v9 }
 0x1ec   : > { %v892_v57 = vadd.f32 %v891_v55, %v3136_v31  ;;  %2113 = vmatprep.mubr.f32.mxu0 %v890_v54  ;;  %2206 = vmatprep.subr.mxu0 %v3050_v12 }
 0x1ed   : > { %v895_v59 = vpop.f32.mrf.mxu0  ;;  %2260 = vmatprep.subr.mxu1 %v3042_v11  ;;  %2207 = vmatpush3.msra.mxu0 %v3050_v12 }
 0x1ee   : > { %v896_v60 = vadd.f32 %v895_v59, %v3133_v25  ;;  %2169 = vmatprep.mubr.f32.mxu1 %v892_v57  ;;  %2261 = vmatpush3.msra.mxu1 %v3042_v11 }
 0x1ef   : > { %v897_v62 = vpop.f32.mrf.mxu0  ;;  %2208 = vmatprep.subr.mxu0 %v3063_v56  ;;  %2262 = vmatprep.subr.mxu1 %v3050_v12 }
 0x1f0   : > { %v898_v1 = vadd.f32 %v897_v62, %v3136_v31  ;;  %2114 = vmatmul.mubr.f32.gmra.mxu0 %v896_v60  ;;  %2263 = vmatpush3.msra.mxu1 %v3050_v12 }
 0x1f1   : > { %v901_v2 = vpop.f32.mrf.mxu0  ;;  %2209 = vmatpush3.msra.mxu0 %v3063_v56  ;;  %2264 = vmatprep.subr.mxu1 %v3063_v56 }
 0x1f2   : > { %v902_v3 = vadd.f32 %v901_v2, %v3133_v25  ;;  %2170 = vmatmul.mubr.f32.gmra.mxu1 %v898_v1 }
 0x1f3   : > { %v903_v5 = vpop.f32.mrf.mxu0  ;;  %2265 = vmatpush3.msra.mxu1 %v3063_v56 }
 0x1f4   : > { %v904_v6 = vadd.f32 %v903_v5, %v3136_v31  ;;  %2116 = vmatprep.mubr.f32.mxu0 %v902_v3 }
 0x1f5   : > { %v907_v7 = vpop.f32.mrf.mxu0 }
 0x1f6   : > { %v908_v9 = vadd.f32 %v907_v7, %v3133_v25  ;;  %2172 = vmatprep.mubr.f32.mxu1 %v904_v6 }
 0x1f7   : > { %v909_v11 = vpop.f32.mrf.mxu0 }
 0x1f8   : > { %v910_v12 = vadd.f32 %v909_v11, %v3136_v31  ;;  %2117 = vmatmul.mubr.f32.gmra.mxu0 %v908_v9 }
 0x1f9   : > { %v913_v8 = vpop.f32.mrf.mxu0 }
 0x1fa   : > { %v914_v21 = vadd.f32 %v913_v8, %v3133_v25  ;;  %2173 = vmatmul.mubr.f32.gmra.mxu1 %v910_v12 }
 0x1fb   : > { %v915_v36 = vpop.f32.mrf.mxu0 }
 0x1fc   : > { %v916_v22 = vadd.f32 %v915_v36, %v3136_v31  ;;  %2119 = vmatprep.mubr.f32.mxu0 %v914_v21 }
 0x1fd   : > { %v919_v56 = vpop.f32.mrf.mxu0 }
 0x1fe   : > { %v3231_v41 = vadd.f32 %v919_v56, %v3133_v25  ;;  %2175 = vmatprep.mubr.f32.mxu1 %v916_v22  ;;  %v3246_v25 = vrot.slane %v3129_v14, %v757_v4  ;;  %v1092_v4 = vunpack.c.l.s4 %v2535_v63 }
 0x1ff   : > { %v921_v47 = vpop.f32.mrf.mxu0 }
 0x200   : > { %v3234_v51 = vadd.f32 %v921_v47, %v3136_v31  ;;  %2120 = vmatmul.mubr.f32.gmra.mxu0 %v3231_v41 }
 0x202   : > { %v1089_v58 = vcombine.high %v3231_v41, %v3234_v51  ;;  %2176 = vmatmul.mubr.f32.gmra.mxu1 %v3234_v51 }
 0x220   : > { %v990_v13 = vpop.f32.mrf.mxu1 }
 0x221   : > { %v991_v31 = vadd.f32 %v990_v13, %v3243_v10 }
 0x222   : > { %v992_v15 = vpop.f32.mrf.mxu1 }
 0x223   : > { %v993_v16 = vadd.f32 %v992_v15, %v3246_v25  ;;  %2210 = vmatprep.mubr.f32.mxu0 %v991_v31 }
 0x224   : > { %v996_v17 = vpop.f32.mrf.mxu1 }
 0x225   : > { %v997_v18 = vadd.f32 %v996_v17, %v3243_v10  ;;  %2266 = vmatprep.mubr.f32.mxu1 %v993_v16  ;;  %v1093_v17 = vunpack.c.0.s8 %v1092_v4 }
 0x226   : > { %v998_v20 = vpop.f32.mrf.mxu1 }
 0x227   : > { %v999_v23 = vadd.f32 %v998_v20, %v3246_v25  ;;  %2211 = vmatmul.mubr.f32.vlgmr.msra.gmra.mxu0 %v997_v18 }
 0x228   : > { %v1002_v24 = vpop.f32.mrf.mxu1 }
 0x229   : > { %v1003_v19 = vadd.f32 %v1002_v24, %v3243_v10  ;;  %2267 = vmatmul.mubr.f32.vlgmr.msra.gmra.mxu1 %v999_v23 }
 0x22a   : > { %v1004_v14 = vpop.f32.mrf.mxu1 }
 0x22b   : > { %v1005_v26 = vadd.f32 %v1004_v14, %v3246_v25  ;;  %2213 = vmatprep.mubr.f32.mxu0 %v1003_v19  ;;  %v1096_v19 = vsub.s32 %v1093_v17, %v3126_v0  ;;  %v3288_v0 = vld [vmem:[%s3483_s4] ss:$0 sm:$0xff] }
 0x22c   : > { %v1008_v27 = vpop.f32.mrf.mxu1 }
 0x22d   : > { %v1009_v28 = vadd.f32 %v1008_v27, %v3243_v10  ;;  %2269 = vmatprep.mubr.f32.mxu1 %v1005_v26  ;;  %v1097_v27 = vrot.slane %v1089_v58, %v1096_v19 }
 0x22e   : > { %v1010_v29 = vpop.f32.mrf.mxu1 }
 0x22f   : > { %v1011_v30 = vadd.f32 %v1010_v29, %v3246_v25  ;;  %2214 = vmatmul.mubr.f32.gmra.mxu0 %v1009_v28 }
 0x230   : > { %v1014_v32 = vpop.f32.mrf.mxu1 }
 0x231   : > { %v1015_v33 = vadd.f32 %v1014_v32, %v3243_v10  ;;  %2270 = vmatmul.mubr.f32.gmra.mxu1 %v1011_v30 }
 0x232   : > { %v1016_v34 = vpop.f32.mrf.mxu1 }
 0x233   : > { %v1017_v35 = vadd.f32 %v1016_v34, %v3246_v25  ;;  %2216 = vmatprep.mubr.f32.mxu0 %v1015_v33 }
 0x234   : > { %v1020_v37 = vpop.f32.mrf.mxu1 }
 0x235   : > { %v1021_v38 = vadd.f32 %v1020_v37, %v3243_v10  ;;  %2272 = vmatprep.mubr.f32.mxu1 %v1017_v35 }
 0x236   : > { %v1022_v39 = vpop.f32.mrf.mxu1 }
 0x237   : > { %v1023_v40 = vadd.f32 %v1022_v39, %v3246_v25  ;;  %2217 = vmatmul.mubr.f32.gmra.mxu0 %v1021_v38 }
 0x238   : > { %v1026_v42 = vpop.f32.mrf.mxu1 }
 0x239   : > { %v1027_v43 = vadd.f32 %v1026_v42, %v3243_v10  ;;  %2273 = vmatmul.mubr.f32.gmra.mxu1 %v1023_v40 }
 0x23a   : > { %v1028_v44 = vpop.f32.mrf.mxu1 }
 0x23b   : > { %v1029_v45 = vadd.f32 %v1028_v44, %v3246_v25  ;;  %2219 = vmatprep.mubr.f32.mxu0 %v1027_v43 }
 0x23c   : > { %v1032_v46 = vpop.f32.mrf.mxu1 }
 0x23d   : > { %v1033_v48 = vadd.f32 %v1032_v46, %v3243_v10  ;;  %2275 = vmatprep.mubr.f32.mxu1 %v1029_v45 }
 0x23e   : > { %v1034_v49 = vpop.f32.mrf.mxu1 }
 0x23f   : > { %v1035_v50 = vadd.f32 %v1034_v49, %v3246_v25  ;;  %2220 = vmatmul.mubr.f32.gmra.mxu0 %v1033_v48 }
 0x240   : > { %v1038_v52 = vpop.f32.mrf.mxu1 }
 0x241   : > { %v1039_v53 = vadd.f32 %v1038_v52, %v3243_v10  ;;  %2276 = vmatmul.mubr.f32.gmra.mxu1 %v1035_v50 }
 0x242   : > { %v1040_v54 = vpop.f32.mrf.mxu1 }
 0x243   : > { %v1041_v55 = vadd.f32 %v1040_v54, %v3246_v25  ;;  %2222 = vmatprep.mubr.f32.mxu0 %v1039_v53 }
 0x244   : > { %v1044_v57 = vpop.f32.mrf.mxu1 }
 0x245   : > { %v1045_v59 = vadd.f32 %v1044_v57, %v3243_v10  ;;  %2278 = vmatprep.mubr.f32.mxu1 %v1041_v55 }
 0x246   : > { %v1046_v60 = vpop.f32.mrf.mxu1 }
 0x247   : > { %v1047_v62 = vadd.f32 %v1046_v60, %v3246_v25  ;;  %2223 = vmatmul.mubr.f32.gmra.mxu0 %v1045_v59 }
 0x248   : > { %v1050_v1 = vpop.f32.mrf.mxu1 }
 0x249   : > { %v1051_v2 = vadd.f32 %v1050_v1, %v3243_v10  ;;  %2279 = vmatmul.mubr.f32.gmra.mxu1 %v1047_v62 }
 0x24a   : > { %v1052_v3 = vpop.f32.mrf.mxu1 }
 0x24b   : > { %v1053_v5 = vadd.f32 %v1052_v3, %v3246_v25  ;;  %2225 = vmatprep.mubr.f32.mxu0 %v1051_v2 }
 0x24c   : > { %v1056_v6 = vpop.f32.mrf.mxu1 }
 0x24d   : > { %v1057_v7 = vadd.f32 %v1056_v6, %v3243_v10  ;;  %2281 = vmatprep.mubr.f32.mxu1 %v1053_v5 }
 0x24e   : > { %v1058_v9 = vpop.f32.mrf.mxu1 }
 0x24f   : > { %v1059_v11 = vadd.f32 %v1058_v9, %v3246_v25  ;;  %2226 = vmatmul.mubr.f32.gmra.mxu0 %v1057_v7 }
 0x250   : > { %v1062_v12 = vpop.f32.mrf.mxu1 }
 0x251   : > { %v1063_v8 = vadd.f32 %v1062_v12, %v3243_v10  ;;  %2282 = vmatmul.mubr.f32.gmra.mxu1 %v1059_v11 }
 0x252   : > { %v1064_v21 = vpop.f32.mrf.mxu1 }
 0x253   : > { %v1065_v36 = vadd.f32 %v1064_v21, %v3246_v25  ;;  %2228 = vmatprep.mubr.f32.mxu0 %v1063_v8 }
 0x254   : > { %v1068_v22 = vpop.f32.mrf.mxu1 }
 0x255   : > { %v1069_v56 = vadd.f32 %v1068_v22, %v3243_v10  ;;  %2284 = vmatprep.mubr.f32.mxu1 %v1065_v36 }
 0x256   : > { %v1070_v47 = vpop.f32.mrf.mxu1 }
 0x257   : > { %v1071_v13 = vadd.f32 %v1070_v47, %v3246_v25  ;;  %2229 = vmatmul.mubr.f32.gmra.mxu0 %v1069_v56 }
 0x258   : > { %v1074_v31 = vpop.f32.mrf.mxu1 }
 0x259   : > { %v1075_v15 = vadd.f32 %v1074_v31, %v3243_v10  ;;  %2285 = vmatmul.mubr.f32.gmra.mxu1 %v1071_v13 }
 0x25a   : > { %v1076_v16 = vpop.f32.mrf.mxu1 }
 0x25b   : > { %v1077_v18 = vadd.f32 %v1076_v16, %v3246_v25  ;;  %2231 = vmatprep.mubr.f32.mxu0 %v1075_v15 }
 0x25c   : > { %v1080_v20 = vpop.f32.mrf.mxu1 }
 0x25d   : > { %v1081_v23 = vadd.f32 %v1080_v20, %v3243_v10  ;;  %2287 = vmatprep.mubr.f32.mxu1 %v1077_v18 }
 0x25e   : > { %v1082_v24 = vpop.f32.mrf.mxu1 }
 0x25f   : > { %v1083_v14 = vadd.f32 %v1082_v24, %v3246_v25  ;;  %2232 = vmatmul.mubr.f32.gmra.mxu0 %v1081_v23 }
 0x261   : > { %v1090_v26 = vcombine.high %v1081_v23, %v1083_v14  ;;  %2288 = vmatmul.mubr.f32.gmra.mxu1 %v1083_v14 }
 0x263   : > { %v1104_v28 = vrot.slane %v1090_v26, %v1096_v19 }
 0x265   : > { %v1105_v29 = vcombine.high %v1097_v27, %v1104_v28 }
 0x267   : > { %v1112_v30 = vrot.slane %v1105_v29, %v1096_v19 }
 0x269   : > { %v1113_v10 = vcombine.high %v1112_v30, %v1112_v30 }
 0x26b   : > { %1119 = vst.msk [vmem:[#allocation2] sm:$0xf] %vm1117_vm1, %v1113_v10 }
 0x288   : > { %v2100_v25 = vpop.f32.mrf.mxu0 }
 0x289   : > { %v1215_v41 = vadd.f32 %v2100_v25, %v3288_v0 }
 0x28a   : > { %v2156_v51 = vpop.f32.mrf.mxu1  ;;  %v1209_v58 = vpop.f32.mrf.mxu0 }
 0x28b   : > { %1727 = vst [vmem:[%s2685_s18 + $0x20] sm:$0xff] %v1215_v41  ;;  %v1360_v32 = vadd.f32 %v2156_v51, %v3288_v0  ;;  %v1210_v61 = vadd.f32 %v3288_v0, %v1209_v58 }
 0x28c   : > { %v1354_v33 = vpop.f32.mrf.mxu1 }
 0x28d   : > { %1728 = vst [vmem:[%s2685_s18 + $0x28] sm:$0xff] %v1360_v32  ;;  %1723 = vst [vmem:[%s2685_s18] sm:$0xff] %v1210_v61  ;;  %v1355_v34 = vadd.f32 %v3288_v0, %v1354_v33 }
 0x28f   : > { %1724 = vst [vmem:[%s2685_s18 + $0x8] sm:$0xff] %v1355_v34 }
 0x290   : > { %v2103_v35 = vpop.f32.mrf.mxu0 }
 0x291   : > { %v1225_v37 = vadd.f32 %v2103_v35, %v3288_v0 }
 0x292   : > { %v1219_v38 = vpop.f32.mrf.mxu0  ;;  %v2159_v39 = vpop.f32.mrf.mxu1 }
 0x293   : > { %1735 = vst [vmem:[%s2685_s18 + $0x60] sm:$0xff] %v1225_v37  ;;  %v1220_v40 = vadd.f32 %v3288_v0, %v1219_v38  ;;  %v1370_v42 = vadd.f32 %v2159_v39, %v3288_v0 }
 0x294   : > { %v1364_v43 = vpop.f32.mrf.mxu1 }
 0x295   : > { %1731 = vst [vmem:[%s2685_s18 + $0x40] sm:$0xff] %v1220_v40  ;;  %1736 = vst [vmem:[%s2685_s18 + $0x68] sm:$0xff] %v1370_v42  ;;  %v1365_v44 = vadd.f32 %v3288_v0, %v1364_v43 }
 0x297   : > { %1732 = vst [vmem:[%s2685_s18 + $0x48] sm:$0xff] %v1365_v44 }
 0x298   : > { %v2106_v45 = vpop.f32.mrf.mxu0 }
 0x299   : > { %v1235_v46 = vadd.f32 %v2106_v45, %v3288_v0 }
 0x29a   : > { %v1229_v48 = vpop.f32.mrf.mxu0  ;;  %v2162_v49 = vpop.f32.mrf.mxu1 }
 0x29b   : > { %1743 = vst [vmem:[%s2685_s18 + $0xa0] sm:$0xff] %v1235_v46  ;;  %v1230_v50 = vadd.f32 %v3288_v0, %v1229_v48  ;;  %v1380_v52 = vadd.f32 %v2162_v49, %v3288_v0 }
 0x29c   : > { %v1374_v53 = vpop.f32.mrf.mxu1 }
 0x29d   : > { %1739 = vst [vmem:[%s2685_s18 + $0x80] sm:$0xff] %v1230_v50  ;;  %1744 = vst [vmem:[%s2685_s18 + $0xa8] sm:$0xff] %v1380_v52  ;;  %v1375_v54 = vadd.f32 %v3288_v0, %v1374_v53 }
 0x29f   : > { %1740 = vst [vmem:[%s2685_s18 + $0x88] sm:$0xff] %v1375_v54 }
 0x2a0   : > { %v2109_v55 = vpop.f32.mrf.mxu0 }
 0x2a1   : > { %v1245_v57 = vadd.f32 %v2109_v55, %v3288_v0 }
 0x2a2   : > { %v1239_v59 = vpop.f32.mrf.mxu0  ;;  %v2165_v60 = vpop.f32.mrf.mxu1 }
 0x2a3   : > { %1751 = vst [vmem:[%s2685_s18 + $0xe0] sm:$0xff] %v1245_v57  ;;  %v1240_v62 = vadd.f32 %v3288_v0, %v1239_v59  ;;  %v1390_v1 = vadd.f32 %v2165_v60, %v3288_v0 }
 0x2a4   : > { %v1384_v2 = vpop.f32.mrf.mxu1 }
 0x2a5   : > { %1747 = vst [vmem:[%s2685_s18 + $0xc0] sm:$0xff] %v1240_v62  ;;  %1752 = vst [vmem:[%s2685_s18 + $0xe8] sm:$0xff] %v1390_v1  ;;  %v1385_v3 = vadd.f32 %v3288_v0, %v1384_v2 }
 0x2a7   : > { %1748 = vst [vmem:[%s2685_s18 + $0xc8] sm:$0xff] %v1385_v3 }
 0x2a8   : > { %v2112_v5 = vpop.f32.mrf.mxu0 }
 0x2a9   : > { %v1255_v6 = vadd.f32 %v2112_v5, %v3288_v0 }
 0x2aa   : > { %v1249_v7 = vpop.f32.mrf.mxu0  ;;  %v2168_v9 = vpop.f32.mrf.mxu1 }
 0x2ab   : > { %1759 = vst [vmem:[%s2685_s18 + $0x120] sm:$0xff] %v1255_v6  ;;  %v1250_v11 = vadd.f32 %v3288_v0, %v1249_v7  ;;  %v1400_v12 = vadd.f32 %v2168_v9, %v3288_v0 }
 0x2ac   : > { %v1394_v8 = vpop.f32.mrf.mxu1 }
 0x2ad   : > { %1755 = vst [vmem:[%s2685_s18 + $0x100] sm:$0xff] %v1250_v11  ;;  %1760 = vst [vmem:[%s2685_s18 + $0x128] sm:$0xff] %v1400_v12  ;;  %v1395_v21 = vadd.f32 %v3288_v0, %v1394_v8 }
 0x2af   : > { %1756 = vst [vmem:[%s2685_s18 + $0x108] sm:$0xff] %v1395_v21 }
 0x2b0   : > { %v2115_v36 = vpop.f32.mrf.mxu0 }
 0x2b1   : > { %v1265_v22 = vadd.f32 %v2115_v36, %v3288_v0 }
 0x2b2   : > { %v1259_v56 = vpop.f32.mrf.mxu0  ;;  %v2171_v47 = vpop.f32.mrf.mxu1 }
 0x2b3   : > { %1767 = vst [vmem:[%s2685_s18 + $0x160] sm:$0xff] %v1265_v22  ;;  %v1260_v63 = vadd.f32 %v3288_v0, %v1259_v56  ;;  %v1410_v4 = vadd.f32 %v2171_v47, %v3288_v0 }
 0x2b4   : > { %v1404_v13 = vpop.f32.mrf.mxu1 }
 0x2b5   : > { %1763 = vst [vmem:[%s2685_s18 + $0x140] sm:$0xff] %v1260_v63  ;;  %1768 = vst [vmem:[%s2685_s18 + $0x168] sm:$0xff] %v1410_v4  ;;  %v1405_v31 = vadd.f32 %v3288_v0, %v1404_v13 }
 0x2b7   : > { %1764 = vst [vmem:[%s2685_s18 + $0x148] sm:$0xff] %v1405_v31 }
 0x2b8   : > { %v2118_v15 = vpop.f32.mrf.mxu0 }
 0x2b9   : > { %v1275_v16 = vadd.f32 %v2118_v15, %v3288_v0 }
 0x2ba   : > { %v1269_v17 = vpop.f32.mrf.mxu0  ;;  %v2174_v18 = vpop.f32.mrf.mxu1 }
 0x2bb   : > { %1775 = vst [vmem:[%s2685_s18 + $0x1a0] sm:$0xff] %v1275_v16  ;;  %v1270_v20 = vadd.f32 %v3288_v0, %v1269_v17  ;;  %v1420_v23 = vadd.f32 %v2174_v18, %v3288_v0 }
 0x2bc   : > { %v1414_v24 = vpop.f32.mrf.mxu1 }
 0x2bd   : > { %1771 = vst [vmem:[%s2685_s18 + $0x180] sm:$0xff] %v1270_v20  ;;  %1776 = vst [vmem:[%s2685_s18 + $0x1a8] sm:$0xff] %v1420_v23  ;;  %v1415_v19 = vadd.f32 %v3288_v0, %v1414_v24 }
 0x2bf   : > { %1772 = vst [vmem:[%s2685_s18 + $0x188] sm:$0xff] %v1415_v19 }
 0x2c0   : > { %v2121_v14 = vpop.f32.mrf.mxu0 }
 0x2c1   : > { %v1285_v26 = vadd.f32 %v2121_v14, %v3288_v0 }
 0x2c2   : > { %v1279_v27 = vpop.f32.mrf.mxu0  ;;  %v2177_v28 = vpop.f32.mrf.mxu1 }
 0x2c3   : > { %1783 = vst [vmem:[%s2685_s18 + $0x1e0] sm:$0xff] %v1285_v26  ;;  %v1280_v29 = vadd.f32 %v3288_v0, %v1279_v27  ;;  %v1430_v30 = vadd.f32 %v2177_v28, %v3288_v0 }
 0x2c4   : > { %v1424_v10 = vpop.f32.mrf.mxu1 }
 0x2c5   : > { %1779 = vst [vmem:[%s2685_s18 + $0x1c0] sm:$0xff] %v1280_v29  ;;  %1784 = vst [vmem:[%s2685_s18 + $0x1e8] sm:$0xff] %v1430_v30  ;;  %v1425_v25 = vadd.f32 %v3288_v0, %v1424_v10 }
 0x2c7   : > { %1780 = vst [vmem:[%s2685_s18 + $0x1c8] sm:$0xff] %v1425_v25 }
 0x2e7   : > { %v2212_v41 = vpop.f32.mrf.mxu0 }
 0x2e8   : > { %v1505_v51 = vadd.f32 %v2212_v41, %v3288_v0 }
 0x2e9   : > { %v1499_v58 = vpop.f32.mrf.mxu0  ;;  %v2268_v32 = vpop.f32.mrf.mxu1 }
 0x2ea   : > { %1729 = vst [vmem:[%s2685_s18 + $0x30] sm:$0xff] %v1505_v51  ;;  %v1500_v61 = vadd.f32 %v3288_v0, %v1499_v58  ;;  %v1650_v33 = vadd.f32 %v2268_v32, %v3288_v0 }
 0x2eb   : > { %v1644_v34 = vpop.f32.mrf.mxu1 }
 0x2ec   : > { %1725 = vst [vmem:[%s2685_s18 + $0x10] sm:$0xff] %v1500_v61  ;;  %1730 = vst [vmem:[%s2685_s18 + $0x38] sm:$0xff] %v1650_v33  ;;  %v1645_v35 = vadd.f32 %v3288_v0, %v1644_v34 }
 0x2ee   : > { %1726 = vst [vmem:[%s2685_s18 + $0x18] sm:$0xff] %v1645_v35 }
 0x2ef   : > { %v2215_v37 = vpop.f32.mrf.mxu0 }
 0x2f0   : > { %v1515_v38 = vadd.f32 %v2215_v37, %v3288_v0 }
 0x2f1   : > { %v1509_v39 = vpop.f32.mrf.mxu0  ;;  %v2271_v40 = vpop.f32.mrf.mxu1 }
 0x2f2   : > { %1737 = vst [vmem:[%s2685_s18 + $0x70] sm:$0xff] %v1515_v38  ;;  %v1510_v42 = vadd.f32 %v3288_v0, %v1509_v39  ;;  %v1660_v43 = vadd.f32 %v2271_v40, %v3288_v0 }
 0x2f3   : > { %v1654_v44 = vpop.f32.mrf.mxu1 }
 0x2f4   : > { %1733 = vst [vmem:[%s2685_s18 + $0x50] sm:$0xff] %v1510_v42  ;;  %1738 = vst [vmem:[%s2685_s18 + $0x78] sm:$0xff] %v1660_v43  ;;  %v1655_v45 = vadd.f32 %v3288_v0, %v1654_v44 }
 0x2f6   : > { %1734 = vst [vmem:[%s2685_s18 + $0x58] sm:$0xff] %v1655_v45 }
 0x2f7   : > { %v2218_v46 = vpop.f32.mrf.mxu0 }
 0x2f8   : > { %v1525_v48 = vadd.f32 %v2218_v46, %v3288_v0 }
 0x2f9   : > { %v1519_v49 = vpop.f32.mrf.mxu0  ;;  %v2274_v50 = vpop.f32.mrf.mxu1 }
 0x2fa   : > { %1745 = vst [vmem:[%s2685_s18 + $0xb0] sm:$0xff] %v1525_v48  ;;  %v1520_v52 = vadd.f32 %v3288_v0, %v1519_v49  ;;  %v1670_v53 = vadd.f32 %v2274_v50, %v3288_v0 }
 0x2fb   : > { %v1664_v54 = vpop.f32.mrf.mxu1 }
 0x2fc   : > { %1741 = vst [vmem:[%s2685_s18 + $0x90] sm:$0xff] %v1520_v52  ;;  %1746 = vst [vmem:[%s2685_s18 + $0xb8] sm:$0xff] %v1670_v53  ;;  %v1665_v55 = vadd.f32 %v3288_v0, %v1664_v54 }
 0x2fe   : > { %1742 = vst [vmem:[%s2685_s18 + $0x98] sm:$0xff] %v1665_v55 }
 0x2ff   : > { %v2221_v57 = vpop.f32.mrf.mxu0 }
 0x300   : > { %v1535_v59 = vadd.f32 %v2221_v57, %v3288_v0 }
 0x301   : > { %v1529_v60 = vpop.f32.mrf.mxu0  ;;  %v2277_v62 = vpop.f32.mrf.mxu1 }
 0x302   : > { %1753 = vst [vmem:[%s2685_s18 + $0xf0] sm:$0xff] %v1535_v59  ;;  %v1530_v1 = vadd.f32 %v3288_v0, %v1529_v60  ;;  %v1680_v2 = vadd.f32 %v2277_v62, %v3288_v0 }
 0x303   : > { %v1674_v3 = vpop.f32.mrf.mxu1 }
 0x304   : > { %1749 = vst [vmem:[%s2685_s18 + $0xd0] sm:$0xff] %v1530_v1  ;;  %1754 = vst [vmem:[%s2685_s18 + $0xf8] sm:$0xff] %v1680_v2  ;;  %v1675_v5 = vadd.f32 %v3288_v0, %v1674_v3 }
 0x306   : > { %1750 = vst [vmem:[%s2685_s18 + $0xd8] sm:$0xff] %v1675_v5 }
 0x307   : > { %v2224_v6 = vpop.f32.mrf.mxu0 }
 0x308   : > { %v1545_v7 = vadd.f32 %v2224_v6, %v3288_v0 }
 0x309   : > { %v1539_v9 = vpop.f32.mrf.mxu0  ;;  %v2280_v11 = vpop.f32.mrf.mxu1 }
 0x30a   : > { %1761 = vst [vmem:[%s2685_s18 + $0x130] sm:$0xff] %v1545_v7  ;;  %v1540_v12 = vadd.f32 %v3288_v0, %v1539_v9  ;;  %v1690_v8 = vadd.f32 %v2280_v11, %v3288_v0 }
 0x30b   : > { %v1684_v21 = vpop.f32.mrf.mxu1 }
 0x30c   : > { %1757 = vst [vmem:[%s2685_s18 + $0x110] sm:$0xff] %v1540_v12  ;;  %1762 = vst [vmem:[%s2685_s18 + $0x138] sm:$0xff] %v1690_v8  ;;  %v1685_v36 = vadd.f32 %v3288_v0, %v1684_v21 }
 0x30e   : > { %1758 = vst [vmem:[%s2685_s18 + $0x118] sm:$0xff] %v1685_v36 }
 0x30f   : > { %v2227_v22 = vpop.f32.mrf.mxu0 }
 0x310   : > { %v1555_v56 = vadd.f32 %v2227_v22, %v3288_v0 }
 0x311   : > { %v1549_v47 = vpop.f32.mrf.mxu0  ;;  %v2283_v63 = vpop.f32.mrf.mxu1 }
 0x312   : > { %1769 = vst [vmem:[%s2685_s18 + $0x170] sm:$0xff] %v1555_v56  ;;  %v1550_v4 = vadd.f32 %v3288_v0, %v1549_v47  ;;  %v1700_v13 = vadd.f32 %v2283_v63, %v3288_v0 }
 0x313   : > { %v1694_v31 = vpop.f32.mrf.mxu1 }
 0x314   : > { %1765 = vst [vmem:[%s2685_s18 + $0x150] sm:$0xff] %v1550_v4  ;;  %1770 = vst [vmem:[%s2685_s18 + $0x178] sm:$0xff] %v1700_v13  ;;  %v1695_v15 = vadd.f32 %v3288_v0, %v1694_v31 }
 0x316   : > { %1766 = vst [vmem:[%s2685_s18 + $0x158] sm:$0xff] %v1695_v15 }
 0x317   : > { %v2230_v16 = vpop.f32.mrf.mxu0 }
 0x318   : > { %v1565_v17 = vadd.f32 %v2230_v16, %v3288_v0 }
 0x319   : > { %v1559_v18 = vpop.f32.mrf.mxu0  ;;  %v2286_v20 = vpop.f32.mrf.mxu1 }
 0x31a   : > { %1777 = vst [vmem:[%s2685_s18 + $0x1b0] sm:$0xff] %v1565_v17  ;;  %v1560_v23 = vadd.f32 %v3288_v0, %v1559_v18  ;;  %v1710_v24 = vadd.f32 %v2286_v20, %v3288_v0 }
 0x31b   : > { %v1704_v19 = vpop.f32.mrf.mxu1 }
 0x31c   : > { %1773 = vst [vmem:[%s2685_s18 + $0x190] sm:$0xff] %v1560_v23  ;;  %1778 = vst [vmem:[%s2685_s18 + $0x1b8] sm:$0xff] %v1710_v24  ;;  %v1705_v14 = vadd.f32 %v3288_v0, %v1704_v19 }
 0x31e   : > { %1774 = vst [vmem:[%s2685_s18 + $0x198] sm:$0xff] %v1705_v14 }
 0x31f   : > { %v2233_v26 = vpop.f32.mrf.mxu0 }
 0x320   : > { %v1575_v27 = vadd.f32 %v2233_v26, %v3288_v0 }
 0x321   : > { %v1569_v28 = vpop.f32.mrf.mxu0  ;;  %v2289_v29 = vpop.f32.mrf.mxu1 }
 0x322   : > { %1785 = vst [vmem:[%s2685_s18 + $0x1f0] sm:$0xff] %v1575_v27  ;;  %v1570_v30 = vadd.f32 %v3288_v0, %v1569_v28  ;;  %v1720_v10 = vadd.f32 %v2289_v29, %v3288_v0 }
 0x323   : > { %v1714_v25 = vpop.f32.mrf.mxu1 }
 0x324   : > { %1781 = vst [vmem:[%s2685_s18 + $0x1d0] sm:$0xff] %v1570_v30  ;;  %1786 = vst [vmem:[%s2685_s18 + $0x1f8] sm:$0xff] %v1720_v10  ;;  %v1715_v41 = vadd.f32 %v3288_v0, %v1714_v25 }
 0x326   : > { %1782 = vst [vmem:[%s2685_s18 + $0x1d8] sm:$0xff] %v1715_v41 }
 0x327   : > { %2441 = shalt.err (!%p2438_p11)
}
 0x328   : > { %s2442_s18 = scalar_lea.hbm %s3420_s28, 8192  ;;  %s2446_s16 = scalar_lea.hbm %s3484_s5, 32768 }
 0x329   : > { %p2443_p13 = scmp.ne.s32.totalorder %s3420_s28, %s2442_s18  ;;  %p2447_p2 = scmp.lt.s32.totalorder %s3420_s28, %s3484_s5 }
 0x32a   : > { %p2448_p8 = scmp.lt.s32.totalorder %s2446_s16, %s2442_s18 }
 0x32b   : > { %p2444_p1 = pnand %p2443_p13, %p2634_p9 }
 0x32c   : > { %p2449_p4 = por %p2448_p8, %p2447_p2 }
 0x32d   : > { %p2445_p0 = pneg %p2444_p1 }
 0x32f   : > { %p2450_p5 = pnand %p2449_p4, %p2445_p0 }
 0x331   : > { %2453 = shalt.err (!%p2450_p5)
}
 0x332   : > { %s2537_s29 = smov 512   ;;  %s2538_s23 = smov 32  }
 0x333   : > { %2292 = dma.vmem_to_hbm [thread:$0]  (%p2634_p9), %s3422_s17, 8192, %s3420_s28, %s1788_s26, %s2537_s29, %s2537_s29, %s2538_s23  }
 0x334 PF: > { %s3498_s21 = sld [smem:[#allocation9_spill]]  ;;  %p2303_p3 = scmp.ge.s32.totalorder %s2524_s25, 2 }
 0x336   : > { %p2299_p6 = pnand %p2303_p3, %p2640_p12 }
 0x338   : > { %p2300_p7 = pneg %p2299_p6 }
 0x33a   : > { %s1819_s22 = sand.u32 1, %s3498_s21  }
 0x33b   : > { %s1820_s27 = scalar_lea.sflag [#allocation5], %s1819_s22 }
 0x33c   : > { %2491 = dma.done.wait (%p2300_p7), %s1820_s27, 8192  }
 0x33d   : > { %2493 = vsyncadd (%p2300_p7), %s1820_s27, 4294959104  ;;  %s21_s25 = sadd.s32 1, %s2524_s25   ;;  %s3499_s21 = sld [smem:[#allocation10_spill]] }
 0x33e   : > { %p18_p10 = scmp.ge.s32.totalorder %s21_s25, 6   ;;  %s3500_s23 = sld [smem:[#allocation11_spill]] }
 0x33f   : > { %s3501_s9 = sld [smem:[#allocation12_spill]]  ;;  %s3502_s18 = smov %s2500_s19 }
 0x340   : > { %s3503_s19 = smov %s2504_s20  ;;  %s3504_s20 = smov %s2647_s14 }
 0x341   : > { %s3505_s22 = smov %s2520_s24  ;;  %20 = sbr.rel (!%p18_p10) target bundleno = 7 (0x7), region = 92 }
 0x345   : > { %s3506_s24 = smov %s3501_s9 }
 0x346   :  { %1825 = vsyncpa [#allocation4], 1 }
 0x347   :  { %1827 = vsyncpa [#allocation4 + $0x1], 1 }
 0x348   :  { %1828 = vsyncpa [#allocation5], 1 }
 0x349   :  { %1830 = vsyncpa [#allocation5 + $0x1], 1 }

</bundles_post_ra>
